<compile_context>
chip_gen: v7x
topology: tpu7x:2x2x1
jax: 0.10.0
libtpu: 0.0.40
codegen_flags: <defaults>
</compile_context>

<pallas_src>
import functools
import math

import jax
import jax.numpy as jnp
from jax.experimental import pallas as pl
from jax.experimental.pallas import tpu as pltpu


# ----------------------------- generic helpers ------------------------------ #

def _pick_tile(dim, candidates):
    """Largest candidate that evenly divides `dim`, else fall back to the full dim."""
    for c in candidates:
        if dim % c == 0:
            return c
    return dim


@functools.lru_cache(maxsize=None)
def _vmem_limit_bytes():
    """Per-generation VMEM limit: ~75% of physical, capped at 96 MiB (>=48 MiB on v7x)."""
    cap = None
    try:
        info = pltpu.get_tpu_info()
        for name in ("vmem_capacity_bytes", "vmem_size_bytes", "vmem_bytes"):
            cap = getattr(info, name, None)
            if cap:
                break
    except Exception:
        cap = None
    if not cap:
        cap = 64 * 1024 * 1024            # conservative fallback = v7x physical VMEM
    return int(min(cap * 3 // 4, 96 * 1024 * 1024))


def _softmax_last(s):
    s = s - jnp.max(s, axis=-1, keepdims=True)
    e = jnp.exp(s)
    return e / jnp.sum(e, axis=-1, keepdims=True)


def _dot_nt(a, b):
    """a @ b.T without an explicit transpose: contract last dims on the MXU."""
    return jax.lax.dot_general(a, b, (((1,), (1,)), ((), ())),
                               preferred_element_type=jnp.float32)


def _bias_act(y, b, activation):
    y = y + b
    if activation == "gelu":
        # exact (erf based) GELU -- matches torch.nn.functional.gelu default
        y = 0.5 * y * (1.0 + jax.lax.erf(y * (1.0 / math.sqrt(2.0))))
    return y


# ------------------------------ linear (matmul) ----------------------------- #

def _linear_kernel_single_k(x_ref, w_ref, b_ref, o_ref, *, activation):
    # K fits in one tile: no accumulator scratch, bias/GELU fused into the store.
    y = jnp.dot(x_ref[...], w_ref[...], preferred_element_type=jnp.float32)
    o_ref[...] = _bias_act(y, b_ref[...], activation).astype(o_ref.dtype)


def _linear_kernel_acc(x_ref, w_ref, b_ref, o_ref, acc_ref, *, activation):
    @pl.when(pl.program_id(2) == 0)
    def _():
        acc_ref[...] = jnp.zeros_like(acc_ref)

    acc_ref[...] += jnp.dot(x_ref[...], w_ref[...],
                            preferred_element_type=jnp.float32)

    @pl.when(pl.program_id(2) == pl.num_programs(2) - 1)
    def _():
        o_ref[...] = _bias_act(acc_ref[...], b_ref[...],
                               activation).astype(o_ref.dtype)


def linear(x, w, b, activation=None, out_dtype=jnp.bfloat16):
    """y = x @ W + b with bf16 MXU operands, f32 accumulation, bf16 (or f32) output."""
    lead = x.shape[:-1]
    x2 = x.reshape(-1, x.shape[-1]).astype(jnp.bfloat16)
    M, K = x2.shape
    N = w.shape[1]
    tm = _pick_tile(M, (512, 256, 128, 64, 32, 16, 8))
    tn = _pick_tile(N, (512, 256, 128))        # 256-multiples keep v6e/v7x MXU full
    tk = _pick_tile(K, (2048, 1024, 512, 256, 128))

    wb = w.astype(jnp.bfloat16)                # no-op: weights stored bf16
    b2 = b.reshape(1, N).astype(jnp.float32)

    cost = pl.CostEstimate(
        flops=2 * M * N * K,
        transcendentals=(M * N if activation == "gelu" else 0),
        bytes_accessed=(M * K + K * N + M * N) * 2 + N * 4)

    single_k = (tk == K)
    sem = (("parallel", "parallel") if single_k
           else ("parallel", "parallel", "arbitrary"))
    cparams = pltpu.CompilerParams(dimension_semantics=sem,
                                   vmem_limit_bytes=_vmem_limit_bytes())

    if single_k:
        out = pl.pallas_call(
            functools.partial(_linear_kernel_single_k, activation=activation),
            out_shape=jax.ShapeDtypeStruct((M, N), out_dtype),
            grid=(M // tm, N // tn),
            in_specs=[pl.BlockSpec((tm, tk), lambda i, j: (i, 0)),
                      pl.BlockSpec((tk, tn), lambda i, j: (0, j)),
                      pl.BlockSpec((1, tn), lambda i, j: (0, j))],
            out_specs=pl.BlockSpec((tm, tn), lambda i, j: (i, j)),
            compiler_params=cparams,
            cost_estimate=cost,
        )(x2, wb, b2)
    else:
        out = pl.pallas_call(
            functools.partial(_linear_kernel_acc, activation=activation),
            out_shape=jax.ShapeDtypeStruct((M, N), out_dtype),
            grid=(M // tm, N // tn, K // tk),
            in_specs=[pl.BlockSpec((tm, tk), lambda i, j, k: (i, k)),
                      pl.BlockSpec((tk, tn), lambda i, j, k: (k, j)),
                      pl.BlockSpec((1, tn), lambda i, j, k: (0, j))],
            out_specs=pl.BlockSpec((tm, tn), lambda i, j, k: (i, j)),
            scratch_shapes=[pltpu.VMEM((tm, tn), jnp.float32)],
            compiler_params=cparams,
            cost_estimate=cost,
        )(x2, wb, b2)
    return out.reshape(*lead, N)


# --------------------------- layernorm (+ residual) -------------------------- #

def _norm_body(x, g, b):
    mu = jnp.mean(x, axis=-1, keepdims=True)
    xc = x - mu
    var = jnp.mean(xc * xc, axis=-1, keepdims=True)
    return (xc * jax.lax.rsqrt(var + 1e-5)) * g + b      # PyTorch LayerNorm eps


def _layernorm_kernel(x_ref, g_ref, b_ref, o_ref):
    o_ref[...] = _norm_body(x_ref[...].astype(jnp.float32),
                            g_ref[...], b_ref[...]).astype(o_ref.dtype)


def _add_layernorm_kernel(x_ref, r_ref, g_ref, b_ref, o_ref):
    h = x_ref[...].astype(jnp.float32) + r_ref[...].astype(jnp.float32)
    o_ref[...] = _norm_body(h, g_ref[...], b_ref[...]).astype(o_ref.dtype)


def _layernorm_call(kernel, operands, gamma, beta):
    d = operands[0].shape[-1]
    lead = operands[0].shape[:-1]
    flats = [t.reshape(-1, d) for t in operands]
    n = flats[0].shape[0]
    tr = _pick_tile(n, (2048, 1024, 512, 256, 128, 64, 32, 16, 8))
    row_spec = pl.BlockSpec((tr, d), lambda i: (i, 0))
    vec_spec = pl.BlockSpec((1, d), lambda i: (0, 0))
    out = pl.pallas_call(
        kernel,
        out_shape=jax.ShapeDtypeStruct((n, d), jnp.bfloat16),
        grid=(n // tr,),
        in_specs=[row_spec] * len(flats) + [vec_spec, vec_spec],
        out_specs=row_spec,
        compiler_params=pltpu.CompilerParams(
            dimension_semantics=("parallel",),
            vmem_limit_bytes=_vmem_limit_bytes()),
    )(*flats, gamma.reshape(1, d).astype(jnp.float32),
      beta.reshape(1, d).astype(jnp.float32))
    return out.reshape(*lead, d)


def layernorm(x, gamma, beta):
    return _layernorm_call(_layernorm_kernel, (x,), gamma, beta)


def add_layernorm(x, residual, gamma, beta):
    # fused (residual + x) -> LayerNorm; halves HBM traffic vs a separate add
    return _layernorm_call(_add_layernorm_kernel, (x, residual), gamma, beta)


# ------------------------------ attention kernels ---------------------------- #

def _heads_per_group(num_heads, dh, qkv_dim):
    """Heads packed per attention grid step so every block is lane-dense:
    hp*dh is a multiple of 128 (unmasked vst) or equals qkv_dim (full last dim)."""
    if qkv_dim <= 128:
        return num_heads
    for hp in range(1, num_heads + 1):
        if num_heads % hp == 0 and (hp * dh) % 128 == 0:
            return hp
    return num_heads


def _landmark_kernel(q_ref, k_ref, ql_ref, kl_ref, ker2_ref, *, hp, dh, scale):
    # blocks: (1, m, r, hp*dh) -> landmark (segment) means over r (VPU reduction,
    # no broadcast / segment-matrix matmul). q side carries the full 1/sqrt(dh).
    q_l = jnp.mean(q_ref[0].astype(jnp.float32), axis=1) * scale     # (m, hp*dh)
    k_l = jnp.mean(k_ref[0].astype(jnp.float32), axis=1)
    ql_ref[0] = q_l.astype(ql_ref.dtype)
    kl_ref[0] = k_l.astype(kl_ref.dtype)
    for h in range(hp):                               # static unroll over packed heads
        sl = slice(h * dh, (h + 1) * dh)
        ker2_ref[0, h] = _softmax_last(_dot_nt(q_l[:, sl], k_l[:, sl]))


def _nystrom_out_kernel(q_ref, k_ref, v_ref, ql_ref, kl_ref, vmat_ref, o_ref,
                        w_scr, *, hp, dh, scale):
    f32, bf16 = jnp.float32, jnp.bfloat16

    @pl.when(pl.program_id(2) == 0)
    def _():
        # Once per (batch, head-group): kv = softmax(q_l k^T) v, then W = V_pinv @ kv.
        # k/v blocks stay resident across the F tiles (index map ignores f).
        k = k_ref[0]                                   # (F, hp*dh) bf16
        v = v_ref[0]
        q_l = ql_ref[0]                                # (m, hp*dh) bf16, pre-scaled
        for h in range(hp):
            sl = slice(h * dh, (h + 1) * dh)
            ker3 = _softmax_last(_dot_nt(q_l[:, sl], k[:, sl]))          # (m, F) f32
            kv = jnp.dot(ker3.astype(bf16), v[:, sl],
                         preferred_element_type=f32)                     # (m, dh)
            # Keep the pseudo-inverse chain in f32 (review correctness concern).
            w_scr[h] = jnp.dot(vmat_ref[0, h], kv, preferred_element_type=f32)

    # Stream tf-sized q tiles: ker1 = softmax(q k_l^T), out = ker1 @ W.
    q = q_ref[0]                                       # (tf, hp*dh) bf16
    k_l = kl_ref[0]                                    # (m, hp*dh) bf16
    outs = []
    for h in range(hp):
        sl = slice(h * dh, (h + 1) * dh)
        ker1 = _softmax_last(_dot_nt(q[:, sl], k_l[:, sl]) * scale)      # (tf, m) f32
        outs.append(jnp.dot(ker1, w_scr[h], preferred_element_type=f32))
    # Single lane-dense store, already in (B, F, qkv_dim) layout (no combine-heads).
    o_ref[0] = jnp.concatenate(outs, axis=-1).astype(o_ref.dtype)


def _full_attn_kernel(q_ref, k_ref, v_ref, o_ref, *, hp, dh, scale):
    # Plain softmax attention branch (num_landmarks == full_len, seq is small).
    # TODO(synk): switch to a kv-tiled flash-style kernel if this branch is ever
    # used with a long full-attention sequence.
    q = q_ref[0]; k = k_ref[0]; v = v_ref[0]           # (F, hp*dh) bf16
    outs = []
    for h in range(hp):
        sl = slice(h * dh, (h + 1) * dh)
        attn = _softmax_last(_dot_nt(q[:, sl], k[:, sl]) * scale)
        outs.append(jnp.dot(attn.astype(jnp.bfloat16), v[:, sl],
                            preferred_element_type=jnp.float32))
    o_ref[0] = jnp.concatenate(outs, axis=-1).astype(o_ref.dtype)


def _iterative_inv(ker2, n_iter):
    """Batched Newton-Schulz pseudo-inverse of (B, H, m, m) in f32 (XLA, fills the
    MXU across all heads at once; hoisted out of the per-head Pallas kernel)."""
    eye = jnp.eye(ker2.shape[-1], dtype=jnp.float32)
    hi = jax.lax.Precision.HIGHEST
    # init_option='original': ONE global max over all batch*heads (matches reference).
    inv_denom = 1.0 / jnp.max(jnp.sum(ker2, axis=-2))
    V = jnp.swapaxes(ker2, -1, -2) * inv_denom
    for _ in range(n_iter):
        KV = jnp.matmul(ker2, V, precision=hi)
        t = 7.0 * eye - KV
        t = 15.0 * eye - jnp.matmul(KV, t, precision=hi)
        t = 13.0 * eye - jnp.matmul(KV, t, precision=hi)
        V = jnp.matmul(0.25 * V, t, precision=hi)
    return V


# ------------------------------ attention wrapper ---------------------------- #

def nystrom_attention(x, p, *, num_heads, num_landmarks, n_iter=6):
    B, S, E = x.shape
    m = num_landmarks
    if S % m:                                   # pad_tensor(): zero pad seq axis
        x = jnp.pad(x, ((0, 0), (0, m - S % m), (0, 0)))
    F = x.shape[1]                              # full_len
    qkv_dim = p["wqkv"].shape[1] // 3
    dh = qkv_dim // num_heads
    scale = 1.0 / math.sqrt(dh)                 # (1/dh**0.25)**2 folded onto q side

    # Fused QKV projection, bf16 out. Heads stay packed in the last dim: NO
    # split_heads transposes anywhere.
    qkv = linear(x, p["wqkv"], p["bqkv"])       # (B, F, 3*qkv_dim) bf16
    # TODO(synk): these contiguous slices are one extra copy pass; a 3-output
    # projection kernel would remove it.
    q, k, v = jnp.split(qkv, 3, axis=-1)        # each (B, F, qkv_dim) bf16

    hp = _heads_per_group(num_heads, dh, qkv_dim)
    gd = hp * dh
    nhg = num_heads // hp
    vlim = _vmem_limit_bytes()

    if m == F:
        out = pl.pallas_call(
            functools.partial(_full_attn_kernel, hp=hp, dh=dh, scale=scale),
            out_shape=jax.ShapeDtypeStruct((B, F, qkv_dim), jnp.bfloat16),
            grid=(B, nhg),
            in_specs=[pl.BlockSpec((1, F, gd), lambda b, g: (b, 0, g))] * 3,
            out_specs=pl.BlockSpec((1, F, gd), lambda b, g: (b, 0, g)),
            compiler_params=pltpu.CompilerParams(
                dimension_semantics=("parallel", "parallel"),
                vmem_limit_bytes=vlim),
        )(q, k, v)
    else:
        r = F // m
        # Pass 1 (parallel over batch x head-groups): landmark means + ker2.
        seg_spec = pl.BlockSpec((1, m, r, gd), lambda b, g: (b, 0, 0, g))
        land_spec = pl.BlockSpec((1, m, gd), lambda b, g: (b, 0, g))
        ker2_spec = pl.BlockSpec((1, hp, m, m), lambda b, g: (b, g, 0, 0))
        q_l, k_l, ker2 = pl.pallas_call(
            functools.partial(_landmark_kernel, hp=hp, dh=dh, scale=scale),
            out_shape=(jax.ShapeDtypeStruct((B, m, qkv_dim), jnp.bfloat16),
                       jax.ShapeDtypeStruct((B, m, qkv_dim), jnp.bfloat16),
                       jax.ShapeDtypeStruct((B, num_heads, m, m), jnp.float32)),
            grid=(B, nhg),
            in_specs=[seg_spec, seg_spec],
            out_specs=(land_spec, land_spec, ker2_spec),
            compiler_params=pltpu.CompilerParams(
                dimension_semantics=("parallel", "parallel"),
                vmem_limit_bytes=vlim),
        )(q.reshape(B, m, r, qkv_dim), k.reshape(B, m, r, qkv_dim))

        # Batched Newton-Schulz between the two passes (global-max init forces a
        # sync here anyway).
        V = _iterative_inv(ker2, n_iter)

        # Pass 2: per (batch, head-group), compute kv / W once (f == 0), then
        # stream tf-sized q tiles; output written lane-dense in (B, F, qkv_dim).
        tf = _pick_tile(F, (2048, 1024, 512, 256, 128, 64, 32, 16, 8))
        nf = F // tf
        qtile_spec = pl.BlockSpec((1, tf, gd), lambda b, g, f: (b, f, g))
        full_spec = pl.BlockSpec((1, F, gd), lambda b, g, f: (b, 0, g))
        land2_spec = pl.BlockSpec((1, m, gd), lambda b, g, f: (b, 0, g))
        vmat_spec = pl.BlockSpec((1, hp, m, m), lambda b, g, f: (b, g, 0, 0))
        out = pl.pallas_call(
            functools.partial(_nystrom_out_kernel, hp=hp, dh=dh, scale=scale),
            out_shape=jax.ShapeDtypeStruct((B, F, qkv_dim), jnp.bfloat16),
            grid=(B, nhg, nf),
            in_specs=[qtile_spec, full_spec, full_spec,
                      land2_spec, land2_spec, vmat_spec],
            out_specs=qtile_spec,
            scratch_shapes=[pltpu.VMEM((hp, m, dh), jnp.float32)],
            compiler_params=pltpu.CompilerParams(
                dimension_semantics=("parallel", "parallel", "arbitrary"),
                vmem_limit_bytes=vlim),
        )(q, k, v, q_l, k_l, V)

    out = out[:, :S]                            # drop seq padding; already (B,S,qkv)
    return linear(out, p["wo"], p["bo"])


# -------------------------------- model blocks ------------------------------- #

def nystromformer_block(x, p, *, num_heads, num_landmarks):
    # Dropout layers are identity at inference; `proj` is unused in the reference
    # forward. Residual adds are fused into the post-LayerNorm kernels.
    a = nystrom_attention(x, p["attn"], num_heads=num_heads,
                          num_landmarks=num_landmarks)
    x = add_layernorm(a, x, p["ln1_g"], p["ln1_b"])        # post-norm (pre_norm=False)
    h = linear(x, p["mlp_w1"], p["mlp_b1"], activation="gelu")
    h = linear(h, p["mlp_w2"], p["mlp_b2"])
    x = add_layernorm(h, x, p["ln2_g"], p["ln2_b"])
    return x


def nystromformer_forward(x, params, *, num_heads, num_landmarks, feat_select="mean"):
    x = x.astype(jnp.bfloat16)                  # bf16 activations end-to-end
    for p in params["layers"]:
        x = nystromformer_block(x, p, num_heads=num_heads,
                                num_landmarks=num_landmarks)
    x = layernorm(x, params["ln_g"], params["ln_b"])
    if feat_select == "last":
        feat = x[:, 0, :]
    elif feat_select == "mean":
        feat = jnp.mean(x.astype(jnp.float32), axis=1)
    else:
        # TODO(synk): feat_select == 'fc' (Linear over the seq axis) not implemented.
        raise NotImplementedError(feat_select)
    return linear(feat, params["fc_w"], params["fc_b"], out_dtype=jnp.float32)


# ------------------------------ parameter setup ------------------------------ #

def _init_linear(key, din, dout):
    kw, kb = jax.random.split(key)
    limit = math.sqrt(6.0 / (din + dout))                  # xavier_uniform-like
    w = jax.random.uniform(kw, (din, dout), jnp.float32, -limit, limit)
    b = jax.random.normal(kb, (dout,), jnp.float32) * 1e-3
    return w.astype(jnp.bfloat16), b                       # weights stored bf16


def init_params(key, depth, emb_dim, qkv_dim, ff_dim, out_dim):
    layers = []
    for _ in range(depth):
        key, *ks = jax.random.split(key, 8)
        wq, bq = _init_linear(ks[0], emb_dim, qkv_dim)
        wk, bk = _init_linear(ks[1], emb_dim, qkv_dim)
        wv, bv = _init_linear(ks[2], emb_dim, qkv_dim)
        wo, bo = _init_linear(ks[3], qkv_dim, emb_dim)
        w1, b1 = _init_linear(ks[4], emb_dim, ff_dim)
        w2, b2 = _init_linear(ks[5], ff_dim, emb_dim)
        layers.append({
            "attn": {"wqkv": jnp.concatenate([wq, wk, wv], axis=1),
                     "bqkv": jnp.concatenate([bq, bk, bv], axis=0),
                     "wo": wo, "bo": bo},
            "ln1_g": jnp.ones((emb_dim,), jnp.float32),
            "ln1_b": jnp.zeros((emb_dim,), jnp.float32),
            "ln2_g": jnp.ones((emb_dim,), jnp.float32),
            "ln2_b": jnp.zeros((emb_dim,), jnp.float32),
            "mlp_w1": w1, "mlp_b1": b1, "mlp_w2": w2, "mlp_b2": b2,
        })
    key, kf = jax.random.split(key)
    fc_w, fc_b = _init_linear(kf, emb_dim, out_dim)
    return {
        "layers": layers,
        "ln_g": jnp.ones((emb_dim,), jnp.float32),
        "ln_b": jnp.zeros((emb_dim,), jnp.float32),
        "fc_w": fc_w, "fc_b": fc_b,
    }


# ----------------------------------- main ------------------------------------ #

if __name__ == "__main__":
    depth, heads, landmarks = 2, 2, 4
    emb_dim, qkv_dim, ff_dim, out_dim = 32, 32, 64, 8
    B, S = 2, 8                                   # S % landmarks == 0, Nystrom path

    key = jax.random.PRNGKey(0)
    key, kx = jax.random.split(key)
    x = jax.random.normal(kx, (B, S, emb_dim), jnp.float32)
    params = init_params(key, depth, emb_dim, qkv_dim, ff_dim, out_dim)

    fwd = jax.jit(functools.partial(
        nystromformer_forward, num_heads=heads, num_landmarks=landmarks,
        feat_select="mean"))
    out = fwd(x, params)
    jax.block_until_ready(out)
    assert out.shape == (B, out_dim) and out.dtype == jnp.float32
    print("KERNEL_OK")
</pallas_src>

<mosaic_0001>
module attributes {stable_mosaic.version = 11 : i64} {
  func.func @_linear_kernel_single_k(%arg0: i32, %arg1: i32, %arg2: memref<16x32xbf16, #tpu.memory_space<vmem>>, %arg3: memref<32x96xbf16, #tpu.memory_space<vmem>>, %arg4: memref<1x96xf32, #tpu.memory_space<vmem>>, %arg5: memref<16x96xbf16, #tpu.memory_space<vmem>>) attributes {dimension_semantics = [#tpu.dimension_semantics<parallel>, #tpu.dimension_semantics<parallel>], iteration_bounds = array<i64: 1, 1>, scalar_prefetch = 0 : i64, scratch_operands = 0 : i64, tpu.core_type = #tpu.core_type<tc>, window_params = [{transform_indices = @transform_0, window_bounds = array<i64: 16, 32>}, {transform_indices = @transform_1, window_bounds = array<i64: 32, 96>}, {transform_indices = @transform_2, window_bounds = array<i64: 1, 96>}, {transform_indices = @transform_3, window_bounds = array<i64: 16, 96>}]} {
    %c0 = arith.constant 0 : index
    %c0_0 = arith.constant 0 : index
    %0 = vector.load %arg2[%c0, %c0_0] : memref<16x32xbf16, #tpu.memory_space<vmem>>, vector<16x32xbf16>
    %c0_1 = arith.constant 0 : index
    %c0_2 = arith.constant 0 : index
    %1 = vector.load %arg3[%c0_1, %c0_2] : memref<32x96xbf16, #tpu.memory_space<vmem>>, vector<32x96xbf16>
    %cst = arith.constant dense<0.000000e+00> : vector<16x96xf32>
    %2 = tpu.matmul %0, %1, %cst {dimension_numbers = #tpu.dot_dimension_numbers<[1], [0], [0], [1], [0, 0, 1, 1], [], []>} : vector<16x32xbf16>, vector<32x96xbf16>, vector<16x96xf32> -> vector<16x96xf32>
    %c0_3 = arith.constant 0 : index
    %c0_4 = arith.constant 0 : index
    %3 = vector.load %arg4[%c0_3, %c0_4] : memref<1x96xf32, #tpu.memory_space<vmem>>, vector<1x96xf32>
    %4 = vector.broadcast %3 : vector<1x96xf32> to vector<16x96xf32>
    %5 = arith.addf %2, %4 : vector<16x96xf32>
    %6 = arith.truncf %5 : vector<16x96xf32> to vector<16x96xbf16>
    %c0_5 = arith.constant 0 : index
    %c0_6 = arith.constant 0 : index
    %7 = vector.load %arg5[%c0_5, %c0_6] : memref<16x96xbf16, #tpu.memory_space<vmem>>, vector<16x96xbf16>
    tpu.vector_store %arg5[%c0_5, %c0_6], %6 {strides = array<i32>} : memref<16x96xbf16, #tpu.memory_space<vmem>>, vector<16x96xbf16>,
    return
  }
  func.func @transform_0(%arg0: i32, %arg1: i32) -> (i32, i32) {
    %c0_i32 = arith.constant 0 : i32
    %c0_i32_0 = arith.constant 0 : i32
    return %arg0, %c0_i32 : i32, i32
  }
  func.func @transform_1(%arg0: i32, %arg1: i32) -> (i32, i32) {
    %c0_i32 = arith.constant 0 : i32
    %c0_i32_0 = arith.constant 0 : i32
    return %c0_i32, %arg1 : i32, i32
  }
  func.func @transform_2(%arg0: i32, %arg1: i32) -> (i32, i32) {
    %c0_i32 = arith.constant 0 : i32
    %c0_i32_0 = arith.constant 0 : i32
    return %c0_i32, %arg1 : i32, i32
  }
  func.func @transform_3(%arg0: i32, %arg1: i32) -> (i32, i32) {
    %c0_i32 = arith.constant 0 : i32
    return %arg0, %arg1 : i32, i32
  }
}

module attributes {stable_mosaic.version = 11 : i64} {
  func.func @_landmark_kernel(%arg0: i32, %arg1: i32, %arg2: memref<1x4x2x32xbf16, #tpu.memory_space<vmem>>, %arg3: memref<1x4x2x32xbf16, #tpu.memory_space<vmem>>, %arg4: memref<1x4x32xbf16, #tpu.memory_space<vmem>>, %arg5: memref<1x4x32xbf16, #tpu.memory_space<vmem>>, %arg6: memref<1x2x4x4xf32, #tpu.memory_space<vmem>>) attributes {dimension_semantics = [#tpu.dimension_semantics<parallel>, #tpu.dimension_semantics<parallel>], iteration_bounds = array<i64: 2, 1>, scalar_prefetch = 0 : i64, scratch_operands = 0 : i64, tpu.core_type = #tpu.core_type<tc>, window_params = [{transform_indices = @transform_0, window_bounds = array<i64: 1, 4, 2, 32>}, {transform_indices = @transform_1, window_bounds = array<i64: 1, 4, 2, 32>}, {transform_indices = @transform_2, window_bounds = array<i64: 1, 4, 32>}, {transform_indices = @transform_3, window_bounds = array<i64: 1, 4, 32>}, {transform_indices = @transform_4, window_bounds = array<i64: 1, 2, 4, 4>}]} {
    %c0 = arith.constant 0 : index
    %c0_0 = arith.constant 0 : index
    %c0_1 = arith.constant 0 : index
    %c0_2 = arith.constant 0 : index
    %0 = vector.load %arg2[%c0, %c0_0, %c0_1, %c0_2] : memref<1x4x2x32xbf16, #tpu.memory_space<vmem>>, vector<1x4x2x32xbf16>
    %1 = vector.shape_cast %0 : vector<1x4x2x32xbf16> to vector<4x2x32xbf16>
    %2 = arith.extf %1 : vector<4x2x32xbf16> to vector<4x2x32xf32>
    %cst = arith.constant dense<0.000000e+00> : vector<4x32xf32>
    %3 = vector.multi_reduction <add>, %2, %cst [1] : vector<4x2x32xf32> to vector<4x32xf32>
    %cst_3 = arith.constant 2.000000e+00 : f32
    %4 = vector.broadcast %cst_3 : f32 to vector<4x32xf32>
    %5 = arith.divf %3, %4 : vector<4x32xf32>
    %cst_4 = arith.constant 2.500000e-01 : f32
    %6 = vector.broadcast %cst_4 : f32 to vector<4x32xf32>
    %7 = arith.mulf %5, %6 : vector<4x32xf32>
    %c0_5 = arith.constant 0 : index
    %c0_6 = arith.constant 0 : index
    %c0_7 = arith.constant 0 : index
    %c0_8 = arith.constant 0 : index
    %8 = vector.load %arg3[%c0_5, %c0_6, %c0_7, %c0_8] : memref<1x4x2x32xbf16, #tpu.memory_space<vmem>>, vector<1x4x2x32xbf16>
    %9 = vector.shape_cast %8 : vector<1x4x2x32xbf16> to vector<4x2x32xbf16>
    %10 = arith.extf %9 : vector<4x2x32xbf16> to vector<4x2x32xf32>
    %cst_9 = arith.constant dense<0.000000e+00> : vector<4x32xf32>
    %11 = vector.multi_reduction <add>, %10, %cst_9 [1] : vector<4x2x32xf32> to vector<4x32xf32>
    %cst_10 = arith.constant 2.000000e+00 : f32
    %12 = vector.broadcast %cst_10 : f32 to vector<4x32xf32>
    %13 = arith.divf %11, %12 : vector<4x32xf32>
    %14 = arith.truncf %7 : vector<4x32xf32> to vector<4x32xbf16>
    %c0_11 = arith.constant 0 : index
    %c0_12 = arith.constant 0 : index
    %c0_13 = arith.constant 0 : index
    %15 = vector.load %arg4[%c0_11, %c0_12, %c0_13] : memref<1x4x32xbf16, #tpu.memory_space<vmem>>, vector<1x4x32xbf16>
    %16 = vector.shape_cast %15 : vector<1x4x32xbf16> to vector<4x32xbf16>
    %17 = vector.shape_cast %14 : vector<4x32xbf16> to vector<1x4x32xbf16>
    tpu.vector_store %arg4[%c0_11, %c0_12, %c0_13], %17 {strides = array<i32>} : memref<1x4x32xbf16, #tpu.memory_space<vmem>>, vector<1x4x32xbf16>,
    %18 = arith.truncf %13 : vector<4x32xf32> to vector<4x32xbf16>
    %c0_14 = arith.constant 0 : index
    %c0_15 = arith.constant 0 : index
    %c0_16 = arith.constant 0 : index
    %19 = vector.load %arg5[%c0_14, %c0_15, %c0_16] : memref<1x4x32xbf16, #tpu.memory_space<vmem>>, vector<1x4x32xbf16>
    %20 = vector.shape_cast %19 : vector<1x4x32xbf16> to vector<4x32xbf16>
    %21 = vector.shape_cast %18 : vector<4x32xbf16> to vector<1x4x32xbf16>
    tpu.vector_store %arg5[%c0_14, %c0_15, %c0_16], %21 {strides = array<i32>} : memref<1x4x32xbf16, #tpu.memory_space<vmem>>, vector<1x4x32xbf16>,
    %22 = vector.extract_strided_slice %7 {offsets = [0, 0], sizes = [4, 16], strides = [1, 1]} : vector<4x32xf32> to vector<4x16xf32>
    %23 = vector.extract_strided_slice %13 {offsets = [0, 0], sizes = [4, 16], strides = [1, 1]} : vector<4x32xf32> to vector<4x16xf32>
    %cst_17 = arith.constant dense<0.000000e+00> : vector<4x4xf32>
    %24 = tpu.matmul %22, %23, %cst_17 {dimension_numbers = #tpu.dot_dimension_numbers<[1], [1], [0], [0], [0, 0, 1, 0], [], []>} : vector<4x16xf32>, vector<4x16xf32>, vector<4x4xf32> -> vector<4x4xf32>
    %cst_18 = arith.constant dense<0xFF800000> : vector<4xf32>
    %25 = vector.multi_reduction <maximumf>, %24, %cst_18 [1] : vector<4x4xf32> to vector<4xf32>
    %26 = vector.shape_cast %25 : vector<4xf32> to vector<4x1xf32>
    %27 = vector.broadcast %26 : vector<4x1xf32> to vector<4x4xf32>
    %28 = arith.subf %24, %27 : vector<4x4xf32>
    %29 = math.exp %28 : vector<4x4xf32>
    %cst_19 = arith.constant dense<0.000000e+00> : vector<4xf32>
    %30 = vector.multi_reduction <add>, %29, %cst_19 [1] : vector<4x4xf32> to vector<4xf32>
    %31 = vector.shape_cast %30 : vector<4xf32> to vector<4x1xf32>
    %32 = vector.broadcast %31 : vector<4x1xf32> to vector<4x4xf32>
    %33 = arith.divf %29, %32 : vector<4x4xf32>
    %c0_20 = arith.constant 0 : index
    %c0_21 = arith.constant 0 : index
    %c0_22 = arith.constant 0 : index
    %c0_23 = arith.constant 0 : index
    %34 = vector.load %arg6[%c0_20, %c0_21, %c0_22, %c0_23] : memref<1x2x4x4xf32, #tpu.memory_space<vmem>>, vector<1x1x4x4xf32>
    %35 = vector.shape_cast %34 : vector<1x1x4x4xf32> to vector<4x4xf32>
    %36 = vector.shape_cast %33 : vector<4x4xf32> to vector<1x1x4x4xf32>
    tpu.vector_store %arg6[%c0_20, %c0_21, %c0_22, %c0_23], %36 {strides = array<i32>} : memref<1x2x4x4xf32, #tpu.memory_space<vmem>>, vector<1x1x4x4xf32>,
    %37 = vector.extract_strided_slice %7 {offsets = [0, 16], sizes = [4, 16], strides = [1, 1]} : vector<4x32xf32> to vector<4x16xf32>
    %38 = vector.extract_strided_slice %13 {offsets = [0, 16], sizes = [4, 16], strides = [1, 1]} : vector<4x32xf32> to vector<4x16xf32>
    %cst_24 = arith.constant dense<0.000000e+00> : vector<4x4xf32>
    %39 = tpu.matmul %37, %38, %cst_24 {dimension_numbers = #tpu.dot_dimension_numbers<[1], [1], [0], [0], [0, 0, 1, 0], [], []>} : vector<4x16xf32>, vector<4x16xf32>, vector<4x4xf32> -> vector<4x4xf32>
    %cst_25 = arith.constant dense<0xFF800000> : vector<4xf32>
    %40 = vector.multi_reduction <maximumf>, %39, %cst_25 [1] : vector<4x4xf32> to vector<4xf32>
    %41 = vector.shape_cast %40 : vector<4xf32> to vector<4x1xf32>
    %42 = vector.broadcast %41 : vector<4x1xf32> to vector<4x4xf32>
    %43 = arith.subf %39, %42 : vector<4x4xf32>
    %44 = math.exp %43 : vector<4x4xf32>
    %cst_26 = arith.constant dense<0.000000e+00> : vector<4xf32>
    %45 = vector.multi_reduction <add>, %44, %cst_26 [1] : vector<4x4xf32> to vector<4xf32>
    %46 = vector.shape_cast %45 : vector<4xf32> to vector<4x1xf32>
    %47 = vector.broadcast %46 : vector<4x1xf32> to vector<4x4xf32>
    %48 = arith.divf %44, %47 : vector<4x4xf32>
    %c0_27 = arith.constant 0 : index
    %c1 = arith.constant 1 : index
    %c0_28 = arith.constant 0 : index
    %c0_29 = arith.constant 0 : index
    %49 = vector.load %arg6[%c0_27, %c1, %c0_28, %c0_29] : memref<1x2x4x4xf32, #tpu.memory_space<vmem>>, vector<1x1x4x4xf32>
    %50 = vector.shape_cast %49 : vector<1x1x4x4xf32> to vector<4x4xf32>
    %51 = vector.shape_cast %48 : vector<4x4xf32> to vector<1x1x4x4xf32>
    tpu.vector_store %arg6[%c0_27, %c1, %c0_28, %c0_29], %51 {strides = array<i32>} : memref<1x2x4x4xf32, #tpu.memory_space<vmem>>, vector<1x1x4x4xf32>,
    return
  }
  func.func @transform_0(%arg0: i32, %arg1: i32) -> (i32, i32, i32, i32) {
    %c0_i32 = arith.constant 0 : i32
    %c0_i32_0 = arith.constant 0 : i32
    %c0_i32_1 = arith.constant 0 : i32
    return %arg0, %c0_i32, %c0_i32_0, %arg1 : i32, i32, i32, i32
  }
  func.func @transform_1(%arg0: i32, %arg1: i32) -> (i32, i32, i32, i32) {
    %c0_i32 = arith.constant 0 : i32
    %c0_i32_0 = arith.constant 0 : i32
    %c0_i32_1 = arith.constant 0 : i32
    return %arg0, %c0_i32, %c0_i32_0, %arg1 : i32, i32, i32, i32
  }
  func.func @transform_2(%arg0: i32, %arg1: i32) -> (i32, i32, i32) {
    %c0_i32 = arith.constant 0 : i32
    %c0_i32_0 = arith.constant 0 : i32
    return %arg0, %c0_i32, %arg1 : i32, i32, i32
  }
  func.func @transform_3(%arg0: i32, %arg1: i32) -> (i32, i32, i32) {
    %c0_i32 = arith.constant 0 : i32
    %c0_i32_0 = arith.constant 0 : i32
    return %arg0, %c0_i32, %arg1 : i32, i32, i32
  }
  func.func @transform_4(%arg0: i32, %arg1: i32) -> (i32, i32, i32, i32) {
    %c0_i32 = arith.constant 0 : i32
    %c0_i32_0 = arith.constant 0 : i32
    %c0_i32_1 = arith.constant 0 : i32
    return %arg0, %arg1, %c0_i32, %c0_i32_0 : i32, i32, i32, i32
  }
}

module attributes {stable_mosaic.version = 11 : i64} {
  func.func @_add_layernorm_kernel(%arg0: i32, %arg1: memref<16x32xbf16, #tpu.memory_space<vmem>>, %arg2: memref<16x32xbf16, #tpu.memory_space<vmem>>, %arg3: memref<1x32xf32, #tpu.memory_space<vmem>>, %arg4: memref<1x32xf32, #tpu.memory_space<vmem>>, %arg5: memref<16x32xbf16, #tpu.memory_space<vmem>>) attributes {dimension_semantics = [#tpu.dimension_semantics<parallel>], iteration_bounds = array<i64: 1>, scalar_prefetch = 0 : i64, scratch_operands = 0 : i64, tpu.core_type = #tpu.core_type<tc>, window_params = [{transform_indices = @transform_0, window_bounds = array<i64: 16, 32>}, {transform_indices = @transform_1, window_bounds = array<i64: 16, 32>}, {pipeline_mode = #tpu.pipeline_mode<synchronous>, transform_indices = @transform_2, window_bounds = array<i64: 1, 32>}, {pipeline_mode = #tpu.pipeline_mode<synchronous>, transform_indices = @transform_3, window_bounds = array<i64: 1, 32>}, {transform_indices = @transform_4, window_bounds = array<i64: 16, 32>}]} {
    %c0 = arith.constant 0 : index
    %c0_0 = arith.constant 0 : index
    %0 = vector.load %arg1[%c0, %c0_0] : memref<16x32xbf16, #tpu.memory_space<vmem>>, vector<16x32xbf16>
    %1 = arith.extf %0 : vector<16x32xbf16> to vector<16x32xf32>
    %c0_1 = arith.constant 0 : index
    %c0_2 = arith.constant 0 : index
    %2 = vector.load %arg2[%c0_1, %c0_2] : memref<16x32xbf16, #tpu.memory_space<vmem>>, vector<16x32xbf16>
    %3 = arith.extf %2 : vector<16x32xbf16> to vector<16x32xf32>
    %4 = arith.addf %1, %3 : vector<16x32xf32>
    %c0_3 = arith.constant 0 : index
    %c0_4 = arith.constant 0 : index
    %5 = vector.load %arg3[%c0_3, %c0_4] : memref<1x32xf32, #tpu.memory_space<vmem>>, vector<1x32xf32>
    %c0_5 = arith.constant 0 : index
    %c0_6 = arith.constant 0 : index
    %6 = vector.load %arg4[%c0_5, %c0_6] : memref<1x32xf32, #tpu.memory_space<vmem>>, vector<1x32xf32>
    %cst = arith.constant dense<0.000000e+00> : vector<16xf32>
    %7 = vector.multi_reduction <add>, %4, %cst [1] : vector<16x32xf32> to vector<16xf32>
    %8 = vector.shape_cast %7 : vector<16xf32> to vector<16x1xf32>
    %cst_7 = arith.constant 3.200000e+01 : f32
    %9 = vector.broadcast %cst_7 : f32 to vector<16x1xf32>
    %10 = arith.divf %8, %9 : vector<16x1xf32>
    %11 = vector.broadcast %10 : vector<16x1xf32> to vector<16x32xf32>
    %12 = arith.subf %4, %11 : vector<16x32xf32>
    %13 = arith.mulf %12, %12 : vector<16x32xf32>
    %cst_8 = arith.constant dense<0.000000e+00> : vector<16xf32>
    %14 = vector.multi_reduction <add>, %13, %cst_8 [1] : vector<16x32xf32> to vector<16xf32>
    %15 = vector.shape_cast %14 : vector<16xf32> to vector<16x1xf32>
    %cst_9 = arith.constant 3.200000e+01 : f32
    %16 = vector.broadcast %cst_9 : f32 to vector<16x1xf32>
    %17 = arith.divf %15, %16 : vector<16x1xf32>
    %cst_10 = arith.constant 9.99999974E-6 : f32
    %18 = vector.broadcast %cst_10 : f32 to vector<16x1xf32>
    %19 = arith.addf %17, %18 : vector<16x1xf32>
    %20 = math.rsqrt %19 : vector<16x1xf32>
    %21 = vector.broadcast %20 : vector<16x1xf32> to vector<16x32xf32>
    %22 = arith.mulf %12, %21 : vector<16x32xf32>
    %23 = vector.broadcast %5 : vector<1x32xf32> to vector<16x32xf32>
    %24 = arith.mulf %22, %23 : vector<16x32xf32>
    %25 = vector.broadcast %6 : vector<1x32xf32> to vector<16x32xf32>
    %26 = arith.addf %24, %25 : vector<16x32xf32>
    %27 = arith.truncf %26 : vector<16x32xf32> to vector<16x32xbf16>
    %c0_11 = arith.constant 0 : index
    %c0_12 = arith.constant 0 : index
    %28 = vector.load %arg5[%c0_11, %c0_12] : memref<16x32xbf16, #tpu.memory_space<vmem>>, vector<16x32xbf16>
    tpu.vector_store %arg5[%c0_11, %c0_12], %27 {strides = array<i32>} : memref<16x32xbf16, #tpu.memory_space<vmem>>, vector<16x32xbf16>,
    return
  }
  func.func @transform_0(%arg0: i32) -> (i32, i32) {
    %c0_i32 = arith.constant 0 : i32
    %c0_i32_0 = arith.constant 0 : i32
    return %arg0, %c0_i32 : i32, i32
  }
  func.func @transform_1(%arg0: i32) -> (i32, i32) {
    %c0_i32 = arith.constant 0 : i32
    %c0_i32_0 = arith.constant 0 : i32
    return %arg0, %c0_i32 : i32, i32
  }
  func.func @transform_2(%arg0: i32) -> (i32, i32) {
    %c0_i32 = arith.constant 0 : i32
    %c0_i32_0 = arith.constant 0 : i32
    %c0_i32_1 = arith.constant 0 : i32
    return %c0_i32, %c0_i32_0 : i32, i32
  }
  func.func @transform_3(%arg0: i32) -> (i32, i32) {
    %c0_i32 = arith.constant 0 : i32
    %c0_i32_0 = arith.constant 0 : i32
    %c0_i32_1 = arith.constant 0 : i32
    return %c0_i32, %c0_i32_0 : i32, i32
  }
  func.func @transform_4(%arg0: i32) -> (i32, i32) {
    %c0_i32 = arith.constant 0 : i32
    %c0_i32_0 = arith.constant 0 : i32
    return %arg0, %c0_i32 : i32, i32
  }
}

module attributes {stable_mosaic.version = 11 : i64} {
  func.func @_linear_kernel_single_k(%arg0: i32, %arg1: i32, %arg2: memref<16x32xbf16, #tpu.memory_space<vmem>>, %arg3: memref<32x64xbf16, #tpu.memory_space<vmem>>, %arg4: memref<1x64xf32, #tpu.memory_space<vmem>>, %arg5: memref<16x64xbf16, #tpu.memory_space<vmem>>) attributes {dimension_semantics = [#tpu.dimension_semantics<parallel>, #tpu.dimension_semantics<parallel>], iteration_bounds = array<i64: 1, 1>, scalar_prefetch = 0 : i64, scratch_operands = 0 : i64, tpu.core_type = #tpu.core_type<tc>, window_params = [{transform_indices = @transform_0, window_bounds = array<i64: 16, 32>}, {transform_indices = @transform_1, window_bounds = array<i64: 32, 64>}, {transform_indices = @transform_2, window_bounds = array<i64: 1, 64>}, {transform_indices = @transform_3, window_bounds = array<i64: 16, 64>}]} {
    %c0 = arith.constant 0 : index
    %c0_0 = arith.constant 0 : index
    %0 = vector.load %arg2[%c0, %c0_0] : memref<16x32xbf16, #tpu.memory_space<vmem>>, vector<16x32xbf16>
    %c0_1 = arith.constant 0 : index
    %c0_2 = arith.constant 0 : index
    %1 = vector.load %arg3[%c0_1, %c0_2] : memref<32x64xbf16, #tpu.memory_space<vmem>>, vector<32x64xbf16>
    %cst = arith.constant dense<0.000000e+00> : vector<16x64xf32>
    %2 = tpu.matmul %0, %1, %cst {dimension_numbers = #tpu.dot_dimension_numbers<[1], [0], [0], [1], [0, 0, 1, 1], [], []>} : vector<16x32xbf16>, vector<32x64xbf16>, vector<16x64xf32> -> vector<16x64xf32>
    %c0_3 = arith.constant 0 : index
    %c0_4 = arith.constant 0 : index
    %3 = vector.load %arg4[%c0_3, %c0_4] : memref<1x64xf32, #tpu.memory_space<vmem>>, vector<1x64xf32>
    %4 = vector.broadcast %3 : vector<1x64xf32> to vector<16x64xf32>
    %5 = arith.addf %2, %4 : vector<16x64xf32>
    %cst_5 = arith.constant 5.000000e-01 : f32
    %6 = vector.broadcast %cst_5 : f32 to vector<16x64xf32>
    %7 = arith.mulf %6, %5 : vector<16x64xf32>
    %cst_6 = arith.constant 0.707106769 : f32
    %8 = vector.broadcast %cst_6 : f32 to vector<16x64xf32>
    %9 = arith.mulf %5, %8 : vector<16x64xf32>
    %10 = math.erf %9 : vector<16x64xf32>
    %cst_7 = arith.constant 1.000000e+00 : f32
    %11 = vector.broadcast %cst_7 : f32 to vector<16x64xf32>
    %12 = arith.addf %11, %10 : vector<16x64xf32>
    %13 = arith.mulf %7, %12 : vector<16x64xf32>
    %14 = arith.truncf %13 : vector<16x64xf32> to vector<16x64xbf16>
    %c0_8 = arith.constant 0 : index
    %c0_9 = arith.constant 0 : index
    %15 = vector.load %arg5[%c0_8, %c0_9] : memref<16x64xbf16, #tpu.memory_space<vmem>>, vector<16x64xbf16>
    tpu.vector_store %arg5[%c0_8, %c0_9], %14 {strides = array<i32>} : memref<16x64xbf16, #tpu.memory_space<vmem>>, vector<16x64xbf16>,
    return
  }
  func.func @transform_0(%arg0: i32, %arg1: i32) -> (i32, i32) {
    %c0_i32 = arith.constant 0 : i32
    %c0_i32_0 = arith.constant 0 : i32
    return %arg0, %c0_i32 : i32, i32
  }
  func.func @transform_1(%arg0: i32, %arg1: i32) -> (i32, i32) {
    %c0_i32 = arith.constant 0 : i32
    %c0_i32_0 = arith.constant 0 : i32
    return %c0_i32, %arg1 : i32, i32
  }
  func.func @transform_2(%arg0: i32, %arg1: i32) -> (i32, i32) {
    %c0_i32 = arith.constant 0 : i32
    %c0_i32_0 = arith.constant 0 : i32
    return %c0_i32, %arg1 : i32, i32
  }
  func.func @transform_3(%arg0: i32, %arg1: i32) -> (i32, i32) {
    %c0_i32 = arith.constant 0 : i32
    return %arg0, %arg1 : i32, i32
  }
}

module attributes {stable_mosaic.version = 11 : i64} {
  func.func @_nystrom_out_kernel(%arg0: i32, %arg1: i32, %arg2: i32, %arg3: memref<1x8x32xbf16, #tpu.memory_space<vmem>>, %arg4: memref<1x8x32xbf16, #tpu.memory_space<vmem>>, %arg5: memref<1x8x32xbf16, #tpu.memory_space<vmem>>, %arg6: memref<1x4x32xbf16, #tpu.memory_space<vmem>>, %arg7: memref<1x4x32xbf16, #tpu.memory_space<vmem>>, %arg8: memref<1x2x4x4xf32, #tpu.memory_space<vmem>>, %arg9: memref<1x8x32xbf16, #tpu.memory_space<vmem>>, %arg10: memref<2x4x16xf32, #tpu.memory_space<vmem>>) attributes {dimension_semantics = [#tpu.dimension_semantics<parallel>, #tpu.dimension_semantics<parallel>, #tpu.dimension_semantics<arbitrary>], iteration_bounds = array<i64: 2, 1, 1>, scalar_prefetch = 0 : i64, scratch_operands = 1 : i64, tpu.core_type = #tpu.core_type<tc>, window_params = [{transform_indices = @transform_0, window_bounds = array<i64: 1, 8, 32>}, {transform_indices = @transform_1, window_bounds = array<i64: 1, 8, 32>}, {transform_indices = @transform_2, window_bounds = array<i64: 1, 8, 32>}, {transform_indices = @transform_3, window_bounds = array<i64: 1, 4, 32>}, {transform_indices = @transform_4, window_bounds = array<i64: 1, 4, 32>}, {transform_indices = @transform_5, window_bounds = array<i64: 1, 2, 4, 4>}, {transform_indices = @transform_6, window_bounds = array<i64: 1, 8, 32>}]} {
    %c0_i32 = arith.constant 0 : i32
    %0 = arith.cmpi eq, %arg2, %c0_i32 : i32
    %1 = arith.extui %0 : i1 to i32
    %c0_i32_0 = arith.constant 0 : i32
    %2 = arith.cmpi ne, %1, %c0_i32_0 : i32
    scf.if %2 {
      %c0_23 = arith.constant 0 : index
      %c0_24 = arith.constant 0 : index
      %c0_25 = arith.constant 0 : index
      %46 = vector.load %arg4[%c0_23, %c0_24, %c0_25] : memref<1x8x32xbf16, #tpu.memory_space<vmem>>, vector<1x8x32xbf16>
      %47 = vector.shape_cast %46 : vector<1x8x32xbf16> to vector<8x32xbf16>
      %c0_26 = arith.constant 0 : index
      %c0_27 = arith.constant 0 : index
      %c0_28 = arith.constant 0 : index
      %48 = vector.load %arg5[%c0_26, %c0_27, %c0_28] : memref<1x8x32xbf16, #tpu.memory_space<vmem>>, vector<1x8x32xbf16>
      %49 = vector.shape_cast %48 : vector<1x8x32xbf16> to vector<8x32xbf16>
      %c0_29 = arith.constant 0 : index
      %c0_30 = arith.constant 0 : index
      %c0_31 = arith.constant 0 : index
      %50 = vector.load %arg6[%c0_29, %c0_30, %c0_31] : memref<1x4x32xbf16, #tpu.memory_space<vmem>>, vector<1x4x32xbf16>
      %51 = vector.shape_cast %50 : vector<1x4x32xbf16> to vector<4x32xbf16>
      %52 = vector.extract_strided_slice %51 {offsets = [0, 0], sizes = [4, 16], strides = [1, 1]} : vector<4x32xbf16> to vector<4x16xbf16>
      %53 = vector.extract_strided_slice %47 {offsets = [0, 0], sizes = [8, 16], strides = [1, 1]} : vector<8x32xbf16> to vector<8x16xbf16>
      %cst_32 = arith.constant dense<0.000000e+00> : vector<4x8xf32>
      %54 = tpu.matmul %52, %53, %cst_32 {dimension_numbers = #tpu.dot_dimension_numbers<[1], [1], [0], [0], [0, 0, 1, 0], [], []>} : vector<4x16xbf16>, vector<8x16xbf16>, vector<4x8xf32> -> vector<4x8xf32>
      %cst_33 = arith.constant dense<0xFF800000> : vector<4xf32>
      %55 = vector.multi_reduction <maximumf>, %54, %cst_33 [1] : vector<4x8xf32> to vector<4xf32>
      %56 = vector.shape_cast %55 : vector<4xf32> to vector<4x1xf32>
      %57 = vector.broadcast %56 : vector<4x1xf32> to vector<4x8xf32>
      %58 = arith.subf %54, %57 : vector<4x8xf32>
      %59 = math.exp %58 : vector<4x8xf32>
      %cst_34 = arith.constant dense<0.000000e+00> : vector<4xf32>
      %60 = vector.multi_reduction <add>, %59, %cst_34 [1] : vector<4x8xf32> to vector<4xf32>
      %61 = vector.shape_cast %60 : vector<4xf32> to vector<4x1xf32>
      %62 = vector.broadcast %61 : vector<4x1xf32> to vector<4x8xf32>
      %63 = arith.divf %59, %62 : vector<4x8xf32>
      %64 = arith.truncf %63 : vector<4x8xf32> to vector<4x8xbf16>
      %65 = vector.extract_strided_slice %49 {offsets = [0, 0], sizes = [8, 16], strides = [1, 1]} : vector<8x32xbf16> to vector<8x16xbf16>
      %cst_35 = arith.constant dense<0.000000e+00> : vector<4x16xf32>
      %66 = tpu.matmul %64, %65, %cst_35 {dimension_numbers = #tpu.dot_dimension_numbers<[1], [0], [0], [1], [0, 0, 1, 1], [], []>} : vector<4x8xbf16>, vector<8x16xbf16>, vector<4x16xf32> -> vector<4x16xf32>
      %c0_36 = arith.constant 0 : index
      %c0_37 = arith.constant 0 : index
      %c0_38 = arith.constant 0 : index
      %c0_39 = arith.constant 0 : index
      %67 = vector.load %arg8[%c0_36, %c0_37, %c0_38, %c0_39] : memref<1x2x4x4xf32, #tpu.memory_space<vmem>>, vector<1x1x4x4xf32>
      %68 = vector.shape_cast %67 : vector<1x1x4x4xf32> to vector<4x4xf32>
      %cst_40 = arith.constant dense<0.000000e+00> : vector<4x16xf32>
      %69 = tpu.matmul %68, %66, %cst_40 {dimension_numbers = #tpu.dot_dimension_numbers<[1], [0], [0], [1], [0, 0, 1, 1], [], []>} : vector<4x4xf32>, vector<4x16xf32>, vector<4x16xf32> -> vector<4x16xf32>
      %c0_41 = arith.constant 0 : index
      %c0_42 = arith.constant 0 : index
      %c0_43 = arith.constant 0 : index
      %70 = vector.load %arg10[%c0_41, %c0_42, %c0_43] : memref<2x4x16xf32, #tpu.memory_space<vmem>>, vector<1x4x16xf32>
      %71 = vector.shape_cast %70 : vector<1x4x16xf32> to vector<4x16xf32>
      %72 = vector.shape_cast %69 : vector<4x16xf32> to vector<1x4x16xf32>
      tpu.vector_store %arg10[%c0_41, %c0_42, %c0_43], %72 {strides = array<i32>} : memref<2x4x16xf32, #tpu.memory_space<vmem>>, vector<1x4x16xf32>,
      %73 = vector.extract_strided_slice %51 {offsets = [0, 16], sizes = [4, 16], strides = [1, 1]} : vector<4x32xbf16> to vector<4x16xbf16>
      %74 = vector.extract_strided_slice %47 {offsets = [0, 16], sizes = [8, 16], strides = [1, 1]} : vector<8x32xbf16> to vector<8x16xbf16>
      %cst_44 = arith.constant dense<0.000000e+00> : vector<4x8xf32>
      %75 = tpu.matmul %73, %74, %cst_44 {dimension_numbers = #tpu.dot_dimension_numbers<[1], [1], [0], [0], [0, 0, 1, 0], [], []>} : vector<4x16xbf16>, vector<8x16xbf16>, vector<4x8xf32> -> vector<4x8xf32>
      %cst_45 = arith.constant dense<0xFF800000> : vector<4xf32>
      %76 = vector.multi_reduction <maximumf>, %75, %cst_45 [1] : vector<4x8xf32> to vector<4xf32>
      %77 = vector.shape_cast %76 : vector<4xf32> to vector<4x1xf32>
      %78 = vector.broadcast %77 : vector<4x1xf32> to vector<4x8xf32>
      %79 = arith.subf %75, %78 : vector<4x8xf32>
      %80 = math.exp %79 : vector<4x8xf32>
      %cst_46 = arith.constant dense<0.000000e+00> : vector<4xf32>
      %81 = vector.multi_reduction <add>, %80, %cst_46 [1] : vector<4x8xf32> to vector<4xf32>
      %82 = vector.shape_cast %81 : vector<4xf32> to vector<4x1xf32>
      %83 = vector.broadcast %82 : vector<4x1xf32> to vector<4x8xf32>
      %84 = arith.divf %80, %83 : vector<4x8xf32>
      %85 = arith.truncf %84 : vector<4x8xf32> to vector<4x8xbf16>
      %86 = vector.extract_strided_slice %49 {offsets = [0, 16], sizes = [8, 16], strides = [1, 1]} : vector<8x32xbf16> to vector<8x16xbf16>
      %cst_47 = arith.constant dense<0.000000e+00> : vector<4x16xf32>
      %87 = tpu.matmul %85, %86, %cst_47 {dimension_numbers = #tpu.dot_dimension_numbers<[1], [0], [0], [1], [0, 0, 1, 1], [], []>} : vector<4x8xbf16>, vector<8x16xbf16>, vector<4x16xf32> -> vector<4x16xf32>
      %c0_48 = arith.constant 0 : index
      %c1_49 = arith.constant 1 : index
      %c0_50 = arith.constant 0 : index
      %c0_51 = arith.constant 0 : index
      %88 = vector.load %arg8[%c0_48, %c1_49, %c0_50, %c0_51] : memref<1x2x4x4xf32, #tpu.memory_space<vmem>>, vector<1x1x4x4xf32>
      %89 = vector.shape_cast %88 : vector<1x1x4x4xf32> to vector<4x4xf32>
      %cst_52 = arith.constant dense<0.000000e+00> : vector<4x16xf32>
      %90 = tpu.matmul %89, %87, %cst_52 {dimension_numbers = #tpu.dot_dimension_numbers<[1], [0], [0], [1], [0, 0, 1, 1], [], []>} : vector<4x4xf32>, vector<4x16xf32>, vector<4x16xf32> -> vector<4x16xf32>
      %c1_53 = arith.constant 1 : index
      %c0_54 = arith.constant 0 : index
      %c0_55 = arith.constant 0 : index
      %91 = vector.load %arg10[%c1_53, %c0_54, %c0_55] : memref<2x4x16xf32, #tpu.memory_space<vmem>>, vector<1x4x16xf32>
      %92 = vector.shape_cast %91 : vector<1x4x16xf32> to vector<4x16xf32>
      %93 = vector.shape_cast %90 : vector<4x16xf32> to vector<1x4x16xf32>
      tpu.vector_store %arg10[%c1_53, %c0_54, %c0_55], %93 {strides = array<i32>} : memref<2x4x16xf32, #tpu.memory_space<vmem>>, vector<1x4x16xf32>,
    } else {
    }
    %c0 = arith.constant 0 : index
    %c0_1 = arith.constant 0 : index
    %c0_2 = arith.constant 0 : index
    %3 = vector.load %arg3[%c0, %c0_1, %c0_2] : memref<1x8x32xbf16, #tpu.memory_space<vmem>>, vector<1x8x32xbf16>
    %4 = vector.shape_cast %3 : vector<1x8x32xbf16> to vector<8x32xbf16>
    %c0_3 = arith.constant 0 : index
    %c0_4 = arith.constant 0 : index
    %c0_5 = arith.constant 0 : index
    %5 = vector.load %arg7[%c0_3, %c0_4, %c0_5] : memref<1x4x32xbf16, #tpu.memory_space<vmem>>, vector<1x4x32xbf16>
    %6 = vector.shape_cast %5 : vector<1x4x32xbf16> to vector<4x32xbf16>
    %7 = vector.extract_strided_slice %4 {offsets = [0, 0], sizes = [8, 16], strides = [1, 1]} : vector<8x32xbf16> to vector<8x16xbf16>
    %8 = vector.extract_strided_slice %6 {offsets = [0, 0], sizes = [4, 16], strides = [1, 1]} : vector<4x32xbf16> to vector<4x16xbf16>
    %cst = arith.constant dense<0.000000e+00> : vector<8x4xf32>
    %9 = tpu.matmul %7, %8, %cst {dimension_numbers = #tpu.dot_dimension_numbers<[1], [1], [0], [0], [0, 0, 1, 0], [], []>} : vector<8x16xbf16>, vector<4x16xbf16>, vector<8x4xf32> -> vector<8x4xf32>
    %cst_6 = arith.constant 2.500000e-01 : f32
    %10 = vector.broadcast %cst_6 : f32 to vector<8x4xf32>
    %11 = arith.mulf %9, %10 : vector<8x4xf32>
    %cst_7 = arith.constant dense<0xFF800000> : vector<8xf32>
    %12 = vector.multi_reduction <maximumf>, %11, %cst_7 [1] : vector<8x4xf32> to vector<8xf32>
    %13 = vector.shape_cast %12 : vector<8xf32> to vector<8x1xf32>
    %14 = vector.broadcast %13 : vector<8x1xf32> to vector<8x4xf32>
    %15 = arith.subf %11, %14 : vector<8x4xf32>
    %16 = math.exp %15 : vector<8x4xf32>
    %cst_8 = arith.constant dense<0.000000e+00> : vector<8xf32>
    %17 = vector.multi_reduction <add>, %16, %cst_8 [1] : vector<8x4xf32> to vector<8xf32>
    %18 = vector.shape_cast %17 : vector<8xf32> to vector<8x1xf32>
    %19 = vector.broadcast %18 : vector<8x1xf32> to vector<8x4xf32>
    %20 = arith.divf %16, %19 : vector<8x4xf32>
    %c0_9 = arith.constant 0 : index
    %c0_10 = arith.constant 0 : index
    %c0_11 = arith.constant 0 : index
    %21 = vector.load %arg10[%c0_9, %c0_10, %c0_11] : memref<2x4x16xf32, #tpu.memory_space<vmem>>, vector<1x4x16xf32>
    %22 = vector.shape_cast %21 : vector<1x4x16xf32> to vector<4x16xf32>
    %cst_12 = arith.constant dense<0.000000e+00> : vector<8x16xf32>
    %23 = tpu.matmul %20, %22, %cst_12 {dimension_numbers = #tpu.dot_dimension_numbers<[1], [0], [0], [1], [0, 0, 1, 1], [], []>} : vector<8x4xf32>, vector<4x16xf32>, vector<8x16xf32> -> vector<8x16xf32>
    %24 = vector.extract_strided_slice %4 {offsets = [0, 16], sizes = [8, 16], strides = [1, 1]} : vector<8x32xbf16> to vector<8x16xbf16>
    %25 = vector.extract_strided_slice %6 {offsets = [0, 16], sizes = [4, 16], strides = [1, 1]} : vector<4x32xbf16> to vector<4x16xbf16>
    %cst_13 = arith.constant dense<0.000000e+00> : vector<8x4xf32>
    %26 = tpu.matmul %24, %25, %cst_13 {dimension_numbers = #tpu.dot_dimension_numbers<[1], [1], [0], [0], [0, 0, 1, 0], [], []>} : vector<8x16xbf16>, vector<4x16xbf16>, vector<8x4xf32> -> vector<8x4xf32>
    %cst_14 = arith.constant 2.500000e-01 : f32
    %27 = vector.broadcast %cst_14 : f32 to vector<8x4xf32>
    %28 = arith.mulf %26, %27 : vector<8x4xf32>
    %cst_15 = arith.constant dense<0xFF800000> : vector<8xf32>
    %29 = vector.multi_reduction <maximumf>, %28, %cst_15 [1] : vector<8x4xf32> to vector<8xf32>
    %30 = vector.shape_cast %29 : vector<8xf32> to vector<8x1xf32>
    %31 = vector.broadcast %30 : vector<8x1xf32> to vector<8x4xf32>
    %32 = arith.subf %28, %31 : vector<8x4xf32>
    %33 = math.exp %32 : vector<8x4xf32>
    %cst_16 = arith.constant dense<0.000000e+00> : vector<8xf32>
    %34 = vector.multi_reduction <add>, %33, %cst_16 [1] : vector<8x4xf32> to vector<8xf32>
    %35 = vector.shape_cast %34 : vector<8xf32> to vector<8x1xf32>
    %36 = vector.broadcast %35 : vector<8x1xf32> to vector<8x4xf32>
    %37 = arith.divf %33, %36 : vector<8x4xf32>
    %c1 = arith.constant 1 : index
    %c0_17 = arith.constant 0 : index
    %c0_18 = arith.constant 0 : index
    %38 = vector.load %arg10[%c1, %c0_17, %c0_18] : memref<2x4x16xf32, #tpu.memory_space<vmem>>, vector<1x4x16xf32>
    %39 = vector.shape_cast %38 : vector<1x4x16xf32> to vector<4x16xf32>
    %cst_19 = arith.constant dense<0.000000e+00> : vector<8x16xf32>
    %40 = tpu.matmul %37, %39, %cst_19 {dimension_numbers = #tpu.dot_dimension_numbers<[1], [0], [0], [1], [0, 0, 1, 1], [], []>} : vector<8x4xf32>, vector<4x16xf32>, vector<8x16xf32> -> vector<8x16xf32>
    %41 = tpu.concatenate %23, %40 in 1 : vector<8x16xf32>, vector<8x16xf32> -> vector<8x32xf32>
    %42 = arith.truncf %41 : vector<8x32xf32> to vector<8x32xbf16>
    %c0_20 = arith.constant 0 : index
    %c0_21 = arith.constant 0 : index
    %c0_22 = arith.constant 0 : index
    %43 = vector.load %arg9[%c0_20, %c0_21, %c0_22] : memref<1x8x32xbf16, #tpu.memory_space<vmem>>, vector<1x8x32xbf16>
    %44 = vector.shape_cast %43 : vector<1x8x32xbf16> to vector<8x32xbf16>
    %45 = vector.shape_cast %42 : vector<8x32xbf16> to vector<1x8x32xbf16>
    tpu.vector_store %arg9[%c0_20, %c0_21, %c0_22], %45 {strides = array<i32>} : memref<1x8x32xbf16, #tpu.memory_space<vmem>>, vector<1x8x32xbf16>,
    return
  }
  func.func @transform_0(%arg0: i32, %arg1: i32, %arg2: i32) -> (i32, i32, i32) {
    %c0_i32 = arith.constant 0 : i32
    return %arg0, %arg2, %arg1 : i32, i32, i32
  }
  func.func @transform_1(%arg0: i32, %arg1: i32, %arg2: i32) -> (i32, i32, i32) {
    %c0_i32 = arith.constant 0 : i32
    %c0_i32_0 = arith.constant 0 : i32
    return %arg0, %c0_i32, %arg1 : i32, i32, i32
  }
  func.func @transform_2(%arg0: i32, %arg1: i32, %arg2: i32) -> (i32, i32, i32) {
    %c0_i32 = arith.constant 0 : i32
    %c0_i32_0 = arith.constant 0 : i32
    return %arg0, %c0_i32, %arg1 : i32, i32, i32
  }
  func.func @transform_3(%arg0: i32, %arg1: i32, %arg2: i32) -> (i32, i32, i32) {
    %c0_i32 = arith.constant 0 : i32
    %c0_i32_0 = arith.constant 0 : i32
    return %arg0, %c0_i32, %arg1 : i32, i32, i32
  }
  func.func @transform_4(%arg0: i32, %arg1: i32, %arg2: i32) -> (i32, i32, i32) {
    %c0_i32 = arith.constant 0 : i32
    %c0_i32_0 = arith.constant 0 : i32
    return %arg0, %c0_i32, %arg1 : i32, i32, i32
  }
  func.func @transform_5(%arg0: i32, %arg1: i32, %arg2: i32) -> (i32, i32, i32, i32) {
    %c0_i32 = arith.constant 0 : i32
    %c0_i32_0 = arith.constant 0 : i32
    %c0_i32_1 = arith.constant 0 : i32
    return %arg0, %arg1, %c0_i32, %c0_i32_0 : i32, i32, i32, i32
  }
  func.func @transform_6(%arg0: i32, %arg1: i32, %arg2: i32) -> (i32, i32, i32) {
    %c0_i32 = arith.constant 0 : i32
    return %arg0, %arg2, %arg1 : i32, i32, i32
  }
}

module attributes {stable_mosaic.version = 11 : i64} {
  func.func @_linear_kernel_single_k(%arg0: i32, %arg1: i32, %arg2: memref<16x32xbf16, #tpu.memory_space<vmem>>, %arg3: memref<32x32xbf16, #tpu.memory_space<vmem>>, %arg4: memref<1x32xf32, #tpu.memory_space<vmem>>, %arg5: memref<16x32xbf16, #tpu.memory_space<vmem>>) attributes {dimension_semantics = [#tpu.dimension_semantics<parallel>, #tpu.dimension_semantics<parallel>], iteration_bounds = array<i64: 1, 1>, scalar_prefetch = 0 : i64, scratch_operands = 0 : i64, tpu.core_type = #tpu.core_type<tc>, window_params = [{transform_indices = @transform_0, window_bounds = array<i64: 16, 32>}, {transform_indices = @transform_1, window_bounds = array<i64: 32, 32>}, {transform_indices = @transform_2, window_bounds = array<i64: 1, 32>}, {transform_indices = @transform_3, window_bounds = array<i64: 16, 32>}]} {
    %c0 = arith.constant 0 : index
    %c0_0 = arith.constant 0 : index
    %0 = vector.load %arg2[%c0, %c0_0] : memref<16x32xbf16, #tpu.memory_space<vmem>>, vector<16x32xbf16>
    %c0_1 = arith.constant 0 : index
    %c0_2 = arith.constant 0 : index
    %1 = vector.load %arg3[%c0_1, %c0_2] : memref<32x32xbf16, #tpu.memory_space<vmem>>, vector<32x32xbf16>
    %cst = arith.constant dense<0.000000e+00> : vector<16x32xf32>
    %2 = tpu.matmul %0, %1, %cst {dimension_numbers = #tpu.dot_dimension_numbers<[1], [0], [0], [1], [0, 0, 1, 1], [], []>} : vector<16x32xbf16>, vector<32x32xbf16>, vector<16x32xf32> -> vector<16x32xf32>
    %c0_3 = arith.constant 0 : index
    %c0_4 = arith.constant 0 : index
    %3 = vector.load %arg4[%c0_3, %c0_4] : memref<1x32xf32, #tpu.memory_space<vmem>>, vector<1x32xf32>
    %4 = vector.broadcast %3 : vector<1x32xf32> to vector<16x32xf32>
    %5 = arith.addf %2, %4 : vector<16x32xf32>
    %6 = arith.truncf %5 : vector<16x32xf32> to vector<16x32xbf16>
    %c0_5 = arith.constant 0 : index
    %c0_6 = arith.constant 0 : index
    %7 = vector.load %arg5[%c0_5, %c0_6] : memref<16x32xbf16, #tpu.memory_space<vmem>>, vector<16x32xbf16>
    tpu.vector_store %arg5[%c0_5, %c0_6], %6 {strides = array<i32>} : memref<16x32xbf16, #tpu.memory_space<vmem>>, vector<16x32xbf16>,
    return
  }
  func.func @transform_0(%arg0: i32, %arg1: i32) -> (i32, i32) {
    %c0_i32 = arith.constant 0 : i32
    %c0_i32_0 = arith.constant 0 : i32
    return %arg0, %c0_i32 : i32, i32
  }
  func.func @transform_1(%arg0: i32, %arg1: i32) -> (i32, i32) {
    %c0_i32 = arith.constant 0 : i32
    %c0_i32_0 = arith.constant 0 : i32
    return %c0_i32, %arg1 : i32, i32
  }
  func.func @transform_2(%arg0: i32, %arg1: i32) -> (i32, i32) {
    %c0_i32 = arith.constant 0 : i32
    %c0_i32_0 = arith.constant 0 : i32
    return %c0_i32, %arg1 : i32, i32
  }
  func.func @transform_3(%arg0: i32, %arg1: i32) -> (i32, i32) {
    %c0_i32 = arith.constant 0 : i32
    return %arg0, %arg1 : i32, i32
  }
}

module attributes {stable_mosaic.version = 11 : i64} {
  func.func @_linear_kernel_single_k(%arg0: i32, %arg1: i32, %arg2: memref<16x64xbf16, #tpu.memory_space<vmem>>, %arg3: memref<64x32xbf16, #tpu.memory_space<vmem>>, %arg4: memref<1x32xf32, #tpu.memory_space<vmem>>, %arg5: memref<16x32xbf16, #tpu.memory_space<vmem>>) attributes {dimension_semantics = [#tpu.dimension_semantics<parallel>, #tpu.dimension_semantics<parallel>], iteration_bounds = array<i64: 1, 1>, scalar_prefetch = 0 : i64, scratch_operands = 0 : i64, tpu.core_type = #tpu.core_type<tc>, window_params = [{transform_indices = @transform_0, window_bounds = array<i64: 16, 64>}, {transform_indices = @transform_1, window_bounds = array<i64: 64, 32>}, {transform_indices = @transform_2, window_bounds = array<i64: 1, 32>}, {transform_indices = @transform_3, window_bounds = array<i64: 16, 32>}]} {
    %c0 = arith.constant 0 : index
    %c0_0 = arith.constant 0 : index
    %0 = vector.load %arg2[%c0, %c0_0] : memref<16x64xbf16, #tpu.memory_space<vmem>>, vector<16x64xbf16>
    %c0_1 = arith.constant 0 : index
    %c0_2 = arith.constant 0 : index
    %1 = vector.load %arg3[%c0_1, %c0_2] : memref<64x32xbf16, #tpu.memory_space<vmem>>, vector<64x32xbf16>
    %cst = arith.constant dense<0.000000e+00> : vector<16x32xf32>
    %2 = tpu.matmul %0, %1, %cst {dimension_numbers = #tpu.dot_dimension_numbers<[1], [0], [0], [1], [0, 0, 1, 1], [], []>} : vector<16x64xbf16>, vector<64x32xbf16>, vector<16x32xf32> -> vector<16x32xf32>
    %c0_3 = arith.constant 0 : index
    %c0_4 = arith.constant 0 : index
    %3 = vector.load %arg4[%c0_3, %c0_4] : memref<1x32xf32, #tpu.memory_space<vmem>>, vector<1x32xf32>
    %4 = vector.broadcast %3 : vector<1x32xf32> to vector<16x32xf32>
    %5 = arith.addf %2, %4 : vector<16x32xf32>
    %6 = arith.truncf %5 : vector<16x32xf32> to vector<16x32xbf16>
    %c0_5 = arith.constant 0 : index
    %c0_6 = arith.constant 0 : index
    %7 = vector.load %arg5[%c0_5, %c0_6] : memref<16x32xbf16, #tpu.memory_space<vmem>>, vector<16x32xbf16>
    tpu.vector_store %arg5[%c0_5, %c0_6], %6 {strides = array<i32>} : memref<16x32xbf16, #tpu.memory_space<vmem>>, vector<16x32xbf16>,
    return
  }
  func.func @transform_0(%arg0: i32, %arg1: i32) -> (i32, i32) {
    %c0_i32 = arith.constant 0 : i32
    %c0_i32_0 = arith.constant 0 : i32
    return %arg0, %c0_i32 : i32, i32
  }
  func.func @transform_1(%arg0: i32, %arg1: i32) -> (i32, i32) {
    %c0_i32 = arith.constant 0 : i32
    %c0_i32_0 = arith.constant 0 : i32
    return %c0_i32, %arg1 : i32, i32
  }
  func.func @transform_2(%arg0: i32, %arg1: i32) -> (i32, i32) {
    %c0_i32 = arith.constant 0 : i32
    %c0_i32_0 = arith.constant 0 : i32
    return %c0_i32, %arg1 : i32, i32
  }
  func.func @transform_3(%arg0: i32, %arg1: i32) -> (i32, i32) {
    %c0_i32 = arith.constant 0 : i32
    return %arg0, %arg1 : i32, i32
  }
}

module attributes {stable_mosaic.version = 11 : i64} {
  func.func @_layernorm_kernel(%arg0: i32, %arg1: memref<16x32xbf16, #tpu.memory_space<vmem>>, %arg2: memref<1x32xf32, #tpu.memory_space<vmem>>, %arg3: memref<1x32xf32, #tpu.memory_space<vmem>>, %arg4: memref<16x32xbf16, #tpu.memory_space<vmem>>) attributes {dimension_semantics = [#tpu.dimension_semantics<parallel>], iteration_bounds = array<i64: 1>, scalar_prefetch = 0 : i64, scratch_operands = 0 : i64, tpu.core_type = #tpu.core_type<tc>, window_params = [{transform_indices = @transform_0, window_bounds = array<i64: 16, 32>}, {pipeline_mode = #tpu.pipeline_mode<synchronous>, transform_indices = @transform_1, window_bounds = array<i64: 1, 32>}, {pipeline_mode = #tpu.pipeline_mode<synchronous>, transform_indices = @transform_2, window_bounds = array<i64: 1, 32>}, {transform_indices = @transform_3, window_bounds = array<i64: 16, 32>}]} {
    %c0 = arith.constant 0 : index
    %c0_0 = arith.constant 0 : index
    %0 = vector.load %arg1[%c0, %c0_0] : memref<16x32xbf16, #tpu.memory_space<vmem>>, vector<16x32xbf16>
    %1 = arith.extf %0 : vector<16x32xbf16> to vector<16x32xf32>
    %c0_1 = arith.constant 0 : index
    %c0_2 = arith.constant 0 : index
    %2 = vector.load %arg2[%c0_1, %c0_2] : memref<1x32xf32, #tpu.memory_space<vmem>>, vector<1x32xf32>
    %c0_3 = arith.constant 0 : index
    %c0_4 = arith.constant 0 : index
    %3 = vector.load %arg3[%c0_3, %c0_4] : memref<1x32xf32, #tpu.memory_space<vmem>>, vector<1x32xf32>
    %cst = arith.constant dense<0.000000e+00> : vector<16xf32>
    %4 = vector.multi_reduction <add>, %1, %cst [1] : vector<16x32xf32> to vector<16xf32>
    %5 = vector.shape_cast %4 : vector<16xf32> to vector<16x1xf32>
    %cst_5 = arith.constant 3.200000e+01 : f32
    %6 = vector.broadcast %cst_5 : f32 to vector<16x1xf32>
    %7 = arith.divf %5, %6 : vector<16x1xf32>
    %8 = vector.broadcast %7 : vector<16x1xf32> to vector<16x32xf32>
    %9 = arith.subf %1, %8 : vector<16x32xf32>
    %10 = arith.mulf %9, %9 : vector<16x32xf32>
    %cst_6 = arith.constant dense<0.000000e+00> : vector<16xf32>
    %11 = vector.multi_reduction <add>, %10, %cst_6 [1] : vector<16x32xf32> to vector<16xf32>
    %12 = vector.shape_cast %11 : vector<16xf32> to vector<16x1xf32>
    %cst_7 = arith.constant 3.200000e+01 : f32
    %13 = vector.broadcast %cst_7 : f32 to vector<16x1xf32>
    %14 = arith.divf %12, %13 : vector<16x1xf32>
    %cst_8 = arith.constant 9.99999974E-6 : f32
    %15 = vector.broadcast %cst_8 : f32 to vector<16x1xf32>
    %16 = arith.addf %14, %15 : vector<16x1xf32>
    %17 = math.rsqrt %16 : vector<16x1xf32>
    %18 = vector.broadcast %17 : vector<16x1xf32> to vector<16x32xf32>
    %19 = arith.mulf %9, %18 : vector<16x32xf32>
    %20 = vector.broadcast %2 : vector<1x32xf32> to vector<16x32xf32>
    %21 = arith.mulf %19, %20 : vector<16x32xf32>
    %22 = vector.broadcast %3 : vector<1x32xf32> to vector<16x32xf32>
    %23 = arith.addf %21, %22 : vector<16x32xf32>
    %24 = arith.truncf %23 : vector<16x32xf32> to vector<16x32xbf16>
    %c0_9 = arith.constant 0 : index
    %c0_10 = arith.constant 0 : index
    %25 = vector.load %arg4[%c0_9, %c0_10] : memref<16x32xbf16, #tpu.memory_space<vmem>>, vector<16x32xbf16>
    tpu.vector_store %arg4[%c0_9, %c0_10], %24 {strides = array<i32>} : memref<16x32xbf16, #tpu.memory_space<vmem>>, vector<16x32xbf16>,
    return
  }
  func.func @transform_0(%arg0: i32) -> (i32, i32) {
    %c0_i32 = arith.constant 0 : i32
    %c0_i32_0 = arith.constant 0 : i32
    return %arg0, %c0_i32 : i32, i32
  }
  func.func @transform_1(%arg0: i32) -> (i32, i32) {
    %c0_i32 = arith.constant 0 : i32
    %c0_i32_0 = arith.constant 0 : i32
    %c0_i32_1 = arith.constant 0 : i32
    return %c0_i32, %c0_i32_0 : i32, i32
  }
  func.func @transform_2(%arg0: i32) -> (i32, i32) {
    %c0_i32 = arith.constant 0 : i32
    %c0_i32_0 = arith.constant 0 : i32
    %c0_i32_1 = arith.constant 0 : i32
    return %c0_i32, %c0_i32_0 : i32, i32
  }
  func.func @transform_3(%arg0: i32) -> (i32, i32) {
    %c0_i32 = arith.constant 0 : i32
    %c0_i32_0 = arith.constant 0 : i32
    return %arg0, %c0_i32 : i32, i32
  }
}

module attributes {stable_mosaic.version = 11 : i64} {
  func.func @_linear_kernel_single_k(%arg0: i32, %arg1: i32, %arg2: memref<2x32xbf16, #tpu.memory_space<vmem>>, %arg3: memref<32x8xbf16, #tpu.memory_space<vmem>>, %arg4: memref<1x8xf32, #tpu.memory_space<vmem>>, %arg5: memref<2x8xf32, #tpu.memory_space<vmem>>) attributes {dimension_semantics = [#tpu.dimension_semantics<parallel>, #tpu.dimension_semantics<parallel>], iteration_bounds = array<i64: 1, 1>, scalar_prefetch = 0 : i64, scratch_operands = 0 : i64, tpu.core_type = #tpu.core_type<tc>, window_params = [{transform_indices = @transform_0, window_bounds = array<i64: 2, 32>}, {transform_indices = @transform_1, window_bounds = array<i64: 32, 8>}, {transform_indices = @transform_2, window_bounds = array<i64: 1, 8>}, {transform_indices = @transform_3, window_bounds = array<i64: 2, 8>}]} {
    %c0 = arith.constant 0 : index
    %c0_0 = arith.constant 0 : index
    %0 = vector.load %arg2[%c0, %c0_0] : memref<2x32xbf16, #tpu.memory_space<vmem>>, vector<2x32xbf16>
    %c0_1 = arith.constant 0 : index
    %c0_2 = arith.constant 0 : index
    %1 = vector.load %arg3[%c0_1, %c0_2] : memref<32x8xbf16, #tpu.memory_space<vmem>>, vector<32x8xbf16>
    %cst = arith.constant dense<0.000000e+00> : vector<2x8xf32>
    %2 = tpu.matmul %0, %1, %cst {dimension_numbers = #tpu.dot_dimension_numbers<[1], [0], [0], [1], [0, 0, 1, 1], [], []>} : vector<2x32xbf16>, vector<32x8xbf16>, vector<2x8xf32> -> vector<2x8xf32>
    %c0_3 = arith.constant 0 : index
    %c0_4 = arith.constant 0 : index
    %3 = vector.load %arg4[%c0_3, %c0_4] : memref<1x8xf32, #tpu.memory_space<vmem>>, vector<1x8xf32>
    %4 = vector.broadcast %3 : vector<1x8xf32> to vector<2x8xf32>
    %5 = arith.addf %2, %4 : vector<2x8xf32>
    %c0_5 = arith.constant 0 : index
    %c0_6 = arith.constant 0 : index
    %6 = vector.load %arg5[%c0_5, %c0_6] : memref<2x8xf32, #tpu.memory_space<vmem>>, vector<2x8xf32>
    tpu.vector_store %arg5[%c0_5, %c0_6], %5 {strides = array<i32>} : memref<2x8xf32, #tpu.memory_space<vmem>>, vector<2x8xf32>,
    return
  }
  func.func @transform_0(%arg0: i32, %arg1: i32) -> (i32, i32) {
    %c0_i32 = arith.constant 0 : i32
    %c0_i32_0 = arith.constant 0 : i32
    return %arg0, %c0_i32 : i32, i32
  }
  func.func @transform_1(%arg0: i32, %arg1: i32) -> (i32, i32) {
    %c0_i32 = arith.constant 0 : i32
    %c0_i32_0 = arith.constant 0 : i32
    return %c0_i32, %arg1 : i32, i32
  }
  func.func @transform_2(%arg0: i32, %arg1: i32) -> (i32, i32) {
    %c0_i32 = arith.constant 0 : i32
    %c0_i32_0 = arith.constant 0 : i32
    return %c0_i32, %arg1 : i32, i32
  }
  func.func @transform_3(%arg0: i32, %arg1: i32) -> (i32, i32) {
    %c0_i32 = arith.constant 0 : i32
    return %arg0, %arg1 : i32, i32
  }
}

</mosaic_0001>

<bundles_post_ra>
// kernel: nystromformer_forward.18
= control target key start
LH: loop header
LB: loop body
LE: loop exit
PB: predicated region body
PF: predicated region fallthrough
CT: control target
= control target key end

     0   :  { %v130_v0 = vmov 0.0   ;;  %vm131_vm0 = vmmov 0   ;;  %vm45_vm1 = vcmask 261120   ;;  %vm98_vm2 = vcmask 781312   ;;  %s170_s1 = inlined_call_operand.vmem [shape: bf16[32,96], index: 1, kind: input, shape index: {}]   ;;  %s171_s0 = inlined_call_operand.vmem [shape: bf16[16,32], index: 0, kind: input, shape index: {}]   ;;  %s172_s2 = inlined_call_operand.vmem [shape: f32[1,96], index: 2, kind: input, shape index: {}]   ;;  %s173_s3 = inlined_call_operand.vmem [shape: bf16[16,96], index: 3, kind: output, shape index: {}]  }
   0x1   :  { %117 = vmatprep.subr.bf16.mxu0 %v130_v0  ;;  %v127_v1 = vld [vmem:[%s170_s1] sm:$0xff]   ;;  %121 = vmatprep.mubr.msk.bf16.mxu0 %vm131_vm0, %v130_v0  ;;  %v128_v2 = vld [vmem:[%s170_s1 + $0x8] sm:$0xff]  }
   0x2   :  { %118 = vmatpush3.bf16.msra.mxu0 %v127_v1  ;;  %v129_v3 = vld [vmem:[%s171_s0] sm:$0xff]  }
   0x3   :  { %119 = vmatprep.subr.bf16.mxu0 %v130_v0  ;;  %v105_v4 = vld [vmem:[%s172_s2] ss:$0 sm:$0xff] }
   0x6   :  { %120 = vmatpush3.bf16.msra.mxu0 %v128_v2 }
   0x9   :  { %122 = vmatmul.mubr.msk.bf16.vlgmr.msra.gmra.mrb[0].mxu0 %vm45_vm1, %v129_v3 }
  0xdc   :  { %v83_v5 = vpop.f32.mrb[0].mxu0 }
  0xdd   :  { %v84_v6 = vadd.f32 %v105_v4, %v83_v5  ;;  %v123_v7 = vpop.f32.mrb[1].mxu0 }
  0xde   :  { %v86_v8 = vpop.f32.mrb[2].mxu0 }
  0xdf   :  { %v112_v9 = vpack.c.bf16 %v84_v6, %v84_v6  ;;  %v87_v10 = vadd.f32 %v105_v4, %v86_v8  ;;  %v124_v11 = vpop.f32.mrb[3].mxu0 }
  0xe1   :  { %99 = vst.msk [vmem:[%s173_s3] sm:$0xf] %vm98_vm2, %v112_v9  ;;  %v113_v12 = vpack.c.bf16 %v87_v10, %v87_v10 }
  0xe3   :  { %100 = vst.msk [vmem:[%s173_s3 + $0x4] sm:$0xf] %vm98_vm2, %v113_v12 }

// kernel: nystromformer_forward.19
= control target key start
LH: loop header
LB: loop body
LE: loop exit
PB: predicated region body
PF: predicated region fallthrough
CT: control target
= control target key end

     0   :  { %s1047_s15 = smov 0   ;;  %s1049_s16 = smov 0   ;;  %s1148_s0 = inlined_call_operand.vmem [shape: bf16[2,4,2,32], index: 0, kind: input, shape index: {}]   ;;  %s1149_s1 = inlined_call_operand.vmem [shape: bf16[2,4,2,32], index: 1, kind: input, shape index: {}]   ;;  %s1150_s2 = inlined_call_operand.vmem [shape: bf16[2,4,32], index: 2, kind: output, shape index: {0}]   ;;  %s1151_s3 = inlined_call_operand.vmem [shape: bf16[2,4,32], index: 3, kind: output, shape index: {1}]   ;;  %s1152_s4 = inlined_call_operand.vmem [shape: f32[2,2,4,4], index: 4, kind: output, shape index: {2}]  }
   0x1   :  { %s1051_s17 = smov 0  }
   0x2 LB: > { %s27_s18 = sadd.s32 1, %s1012_s16  ;;  %p929_p0 = scmp.ge.s32.totalorder %s1016_s17, 1  ;;  %s1016_s17 = sphi %s1051_s17, %s15_s17   ;;  %s1012_s16 = sphi %s1049_s16, %s1154_s16   ;;  %s1008_s15 = sphi %s1047_s15, %s1153_s15  }
   0x3   : > { %p29_p1 = scmp.ge.s32.totalorder %s27_s18, 2  ;;  %p203_p2 = scmp.lt.s32.totalorder %s1016_s17, 3 }
   0x5   : > { %s1156_s18 = smov (%p29_p1, %s27_s18), 0  ;;  %p204_p3 = pnand %p929_p0, %p203_p2 }
   0x6   : > { %p256_p4 = scmp.lt.s32.totalorder (!%p204_p3), %s1008_s15, 1  ;;  %v391_v0 = vlaneseq (!%p204_p3)  ;;  %v1018_v1 = vmov (!%p204_p3), 0.0   ;;  %v1019_v2 = vmov (!%p204_p3), 1983009808   ;;  %vm1020_vm0 = vmmov (!%p204_p3), 0   ;;  %s1021_s26 = smov (!%p204_p3), 112  }
   0x7   : > { %207 = sbr.rel (%p204_p3) target bundleno = 690 (0x2b2), region = 28  ;;  %948 = vmatprep.subr.mxu0 (!%p204_p3), %v1018_v1  ;;  %v389_v3 = vunpack.c.l.s4 (!%p204_p3), %v1019_v2  ;;  %953 = vmatprep.subr.mxu1 (!%p204_p3), %v1018_v1  ;;  %vm302_vm1 = vcmask (!%p204_p3), 254976   ;;  %vm449_vm2 = vcmask (!%p204_p3), 1041409   ;;  %vm452_vm3 = vcmask (!%p204_p3), 1042434  }
   0x8   : > { %950 = vmatprep.mubr.msk.f32.mxu0 (!%p204_p3), %vm1020_vm0, %v1018_v1  ;;  %955 = vmatprep.mubr.msk.f32.mxu1 (!%p204_p3), %vm1020_vm0, %v1018_v1  ;;  %v392_v5 = vshrl.u32 (!%p204_p3), %v391_v0, 7  ;;  %vm455_vm4 = vcmask (!%p204_p3), 1043459   ;;  %vm565_vm5 = vcmask (!%p204_p3), 130048   ;;  %vm640_vm6 = vcmask (!%p204_p3), 27648  }
   0x9   : > { %v390_v4 = vunpack.c.0.s8 (!%p204_p3), %v389_v3 }
   0xb   : > { %v1074_v16 = vsub.s32 (!%p204_p3), %v390_v4, %v392_v5 }
   0xe   : > { %s1158_s15 = smov (!%p256_p4, %s1008_s15), 1 }
   0xf   : > { %s930_s19 = sshll.u32 %s1158_s15, 2  ;;  %s932_s27 = sshll.u32 %s1158_s15, 1 }
  0x10   : > { %s269_s22 = scalar_lea.vmem %s1149_s1, %s930_s19  ;;  %s262_s25 = scalar_lea.vmem %s1148_s0, %s930_s19 }
  0x11   : > { %v340_v6 = vld [vmem:[%s269_s22] sm:$0x1]  ;;  %v341_v7 = vld [vmem:[%s269_s22 + $0x1] sm:$0x1]  ;;  %v342_v8 = vld [vmem:[%s269_s22 + $0x2] sm:$0x1]  ;;  %s283_s30 = scalar_lea.vmem %s1151_s3, %s932_s27  ;;  %s276_s7 = scalar_lea.vmem %s1150_s2, %s932_s27 }
  0x12   : > { %v343_v9 = vld [vmem:[%s269_s22 + $0x3] sm:$0x1]  ;;  %v344_v10 = vunpack.c.l.bf16 %v340_v6  ;;  %v345_v11 = vunpack.c.l.bf16 %v341_v7  ;;  %v346_v12 = vunpack.c.l.bf16 %v342_v8  ;;  %v294_v13 = vld [vmem:[%s262_s25] sm:$0x1]  ;;  %v295_v14 = vld [vmem:[%s262_s25 + $0x1] sm:$0x1] }
  0x13   : > { %v347_v15 = vunpack.c.l.bf16 %v343_v9  ;;  %v296_v17 = vld [vmem:[%s262_s25 + $0x2] sm:$0x1]  ;;  %v297_v18 = vld [vmem:[%s262_s25 + $0x3] sm:$0x1]  ;;  %v298_v19 = vunpack.c.l.bf16 %v294_v13  ;;  %v299_v20 = vunpack.c.l.bf16 %v295_v14  ;;  %s943_s8 = sshll.u32 %s1158_s15, 3 }
  0x14   : > { %v348_v21 = vsel %vm302_vm1, %v344_v10, 0.0  ;;  %v355_v22 = vsel %vm302_vm1, %v345_v11, 0.0  ;;  %v362_v23 = vsel %vm302_vm1, %v346_v12, 0.0  ;;  %v300_v24 = vunpack.c.l.bf16 %v296_v17  ;;  %s292_s11 = scalar_lea.vmem %s1152_s4, %s943_s8 }
  0x15   : > { %v349_v25 = vrot.slane %v348_v21, 4  ;;  %v356_v26 = vrot.slane %v355_v22, 4  ;;  %v363_v27 = vrot.slane %v362_v23, 4  ;;  %v369_v28 = vsel %vm302_vm1, %v347_v15, 0.0 }
  0x16   : > { %v370_v29 = vrot.slane %v369_v28, 4  ;;  %v301_v30 = vunpack.c.l.bf16 %v297_v18  ;;  %v303_v31 = vsel %vm302_vm1, %v298_v19, 0.0  ;;  %v310_v32 = vsel %vm302_vm1, %v299_v20, 0.0 }
  0x17   : > { %v350_v33 = vadd.f32 %v349_v25, %v348_v21  ;;  %v357_v34 = vadd.f32 %v356_v26, %v355_v22  ;;  %v364_v35 = vadd.f32 %v363_v27, %v362_v23  ;;  %v304_v36 = vrot.slane %v303_v31, 4 }
  0x18   : > { %v371_v37 = vadd.f32 %v370_v29, %v369_v28  ;;  %v311_v38 = vrot.slane %v310_v32, 4  ;;  %v317_v39 = vsel %vm302_vm1, %v300_v24, 0.0  ;;  %v324_v40 = vsel %vm302_vm1, %v301_v30, 0.0 }
  0x19   : > { %v351_v41 = vrot.slane %v350_v33, 2  ;;  %v358_v42 = vrot.slane %v357_v34, 2  ;;  %v365_v43 = vrot.slane %v364_v35, 2  ;;  %v305_v44 = vadd.f32 %v304_v36, %v303_v31 }
  0x1a   : > { %v372_v45 = vrot.slane %v371_v37, 2  ;;  %v312_v46 = vadd.f32 %v311_v38, %v310_v32  ;;  %v318_v47 = vrot.slane %v317_v39, 4  ;;  %v325_v48 = vrot.slane %v324_v40, 4 }
  0x1b   : > { %v352_v49 = vadd.f32 %v351_v41, %v350_v33  ;;  %v359_v50 = vadd.f32 %v358_v42, %v357_v34  ;;  %v366_v51 = vadd.f32 %v365_v43, %v364_v35  ;;  %v306_v52 = vrot.slane %v305_v44, 2 }
  0x1c   : > { %v373_v53 = vadd.f32 %v372_v45, %v371_v37  ;;  %v313_v54 = vrot.slane %v312_v46, 2  ;;  %v319_v55 = vadd.f32 %v318_v47, %v317_v39  ;;  %v326_v56 = vadd.f32 %v325_v48, %v324_v40 }
  0x1d   : > { %v353_v57 = vrot.slane %v352_v49, 1  ;;  %v360_v58 = vrot.slane %v359_v50, 1  ;;  %v367_v59 = vrot.slane %v366_v51, 1  ;;  %v307_v60 = vadd.f32 %v306_v52, %v305_v44 }
  0x1e   : > { %v374_v61 = vrot.slane %v373_v53, 1  ;;  %v314_v62 = vadd.f32 %v313_v54, %v312_v46  ;;  %v320_v63 = vrot.slane %v319_v55, 2  ;;  %v327_v0 = vrot.slane %v326_v56, 2 }
  0x1f   : > { %v354_v1 = vadd.f32 %v353_v57, %v352_v49  ;;  %v361_v2 = vadd.f32 %v360_v58, %v359_v50  ;;  %v368_v3 = vadd.f32 %v367_v59, %v366_v51  ;;  %v308_v4 = vrot.slane %v307_v60, 1 }
  0x20   : > { %v375_v5 = vadd.f32 %v374_v61, %v373_v53  ;;  %v315_v6 = vrot.slane %v314_v62, 1  ;;  %v321_v7 = vadd.f32 %v320_v63, %v319_v55  ;;  %v328_v8 = vadd.f32 %v327_v0, %v326_v56 }
  0x21   : > { %v376_v9 = vmul.f32 0.5, %v354_v1  ;;  %v377_v10 = vmul.f32 0.5, %v361_v2  ;;  %v378_v11 = vmul.f32 0.5, %v368_v3  ;;  %v309_v12 = vadd.f32 %v308_v4, %v307_v60 }
  0x22   : > { %v379_v13 = vmul.f32 0.5, %v375_v5  ;;  %v316_v14 = vadd.f32 %v315_v6, %v314_v62  ;;  %v322_v15 = vrot.slane %v321_v7, 1  ;;  %v329_v17 = vrot.slane %v328_v8, 1 }
  0x23   : > { %v468_v18 = vpack.c.bf16 %v377_v10, %v377_v10  ;;  %v469_v19 = vpack.c.bf16 %v378_v11, %v378_v11  ;;  %v562_v20 = vsel %vm449_vm2, %v377_v10, %v376_v9  ;;  %v467_v21 = vpack.c.bf16 %v376_v9, %v376_v9 }
  0x24   : > { %v470_v22 = vpack.c.bf16 %v379_v13, %v379_v13  ;;  %v563_v23 = vsel %vm452_vm3, %v378_v11, %v562_v20  ;;  %v323_v24 = vadd.f32 %v322_v15, %v321_v7  ;;  %v330_v25 = vadd.f32 %v329_v17, %v328_v8 }
  0x25   : > { %v488_v26 = vrot.slane %v468_v18, %v1074_v16  ;;  %v495_v27 = vrot.slane %v469_v19, %v1074_v16  ;;  %v564_v28 = vsel %vm455_vm4, %v379_v13, %v563_v23  ;;  %v481_v29 = vrot.slane %v467_v21, %v1074_v16 }
  0x26   : > { %v502_v30 = vrot.slane %v470_v22, %v1074_v16  ;;  %655 = vrot.lane.b32.xlu0 %v564_v28, %s1021_s26  ;;  %949 = vmatpush3.xpose.msk.msra.mxu0 %vm565_vm5, %v564_v28  ;;  %v332_v31 = vmul.f32 0.5, %v309_v12  ;;  %v333_v32 = vmul.f32 0.5, %v316_v14  ;;  %v334_v33 = vmul.f32 0.5, %v323_v24 }
  0x27   : > { %v516_v34 = vrot.slane %v488_v26, %v1074_v16  ;;  %v523_v35 = vrot.slane %v495_v27, %v1074_v16  ;;  %v509_v36 = vrot.slane %v481_v29, %v1074_v16  ;;  %v335_v37 = vmul.f32 0.5, %v330_v25 }
  0x28   : > { %v530_v38 = vrot.slane %v502_v30, %v1074_v16  ;;  %v336_v39 = vmul.f32 0.25, %v332_v31  ;;  %v337_v40 = vmul.f32 0.25, %v333_v32  ;;  %v338_v41 = vmul.f32 0.25, %v334_v33 }
  0x29   : > { %v532_v42 = vunpack.c.l.b16 %v516_v34  ;;  %v533_v43 = vunpack.c.l.b16 %v523_v35  ;;  %v531_v44 = vunpack.c.l.b16 %v509_v36  ;;  %v339_v45 = vmul.f32 0.25, %v335_v37 }
  0x2a   : > { %v534_v46 = vunpack.c.l.b16 %v530_v38  ;;  %v380_v47 = vpack.c.bf16 %v336_v39, %v336_v39  ;;  %v381_v48 = vpack.c.bf16 %v337_v40, %v337_v40  ;;  %v382_v49 = vpack.c.bf16 %v338_v41, %v338_v41 }
  0x2b   : > { %v535_v50 = vrot.slane %v532_v42, 7  ;;  %v537_v51 = vrot.slane %v533_v43, 6  ;;  %v383_v52 = vpack.c.bf16 %v339_v45, %v339_v45  ;;  %v555_v53 = vsel %vm449_vm2, %v337_v40, %v336_v39 }
  0x2c   : > { %v539_v54 = vrot.slane %v534_v46, 5  ;;  %v394_v55 = vrot.slane %v380_v47, %v1074_v16  ;;  %v401_v56 = vrot.slane %v381_v48, %v1074_v16  ;;  %v408_v57 = vrot.slane %v382_v49, %v1074_v16 }
  0x2d   : > { %v536_v58 = vsel %vm449_vm2, %v535_v50, %v531_v44  ;;  %v415_v59 = vrot.slane %v383_v52, %v1074_v16  ;;  %v556_v60 = vsel %vm452_vm3, %v338_v41, %v555_v53 }
  0x2e   : > { %v538_v61 = vsel %vm452_vm3, %v537_v51, %v536_v58  ;;  %v422_v62 = vrot.slane %v394_v55, %v1074_v16  ;;  %v429_v63 = vrot.slane %v401_v56, %v1074_v16  ;;  %v436_v0 = vrot.slane %v408_v57, %v1074_v16 }
  0x2f   : > { %v540_v1 = vsel %vm455_vm4, %v539_v54, %v538_v61  ;;  %v443_v2 = vrot.slane %v415_v59, %v1074_v16  ;;  %v557_v3 = vsel %vm455_vm4, %v339_v45, %v556_v60 }
  0x30   : > { %v541_v4 = vpack.c.b16 %v540_v1, %v540_v1  ;;  %v444_v5 = vunpack.c.l.b16 %v422_v62  ;;  %v445_v6 = vunpack.c.l.b16 %v429_v63  ;;  %v446_v7 = vunpack.c.l.b16 %v436_v0  ;;  %951 = vmatmul.mubr.msk.f32.vlgmr.msra.gmra.mrb[0].mxu0 %vm565_vm5, %v557_v3  ;;  %653 = vrot.lane.b32.xlu0 %v557_v3, %s1021_s26 }
  0x31   : > { %v447_v8 = vunpack.c.l.b16 %v443_v2 }
  0x32   : > { %v548_v9 = vrot.slane %v541_v4, %v1074_v16  ;;  %v448_v10 = vrot.slane %v445_v6, 7  ;;  %v451_v11 = vrot.slane %v446_v7, 6 }
  0x33   : > { %v454_v12 = vrot.slane %v447_v8, 5 }
  0x34   : > { %550 = vst.msk [vmem:[%s283_s30] sm:$0x3] %vm302_vm1, %v548_v9  ;;  %v450_v13 = vsel %vm449_vm2, %v448_v10, %v444_v5 }
  0x35   : > { %v453_v14 = vsel %vm452_vm3, %v451_v11, %v450_v13 }
  0x36   : > { %v456_v15 = vsel %vm455_vm4, %v454_v12, %v453_v14 }
  0x37   : > { %v457_v17 = vpack.c.b16 %v456_v15, %v456_v15 }
  0x39   : > { %v464_v18 = vrot.slane %v457_v17, %v1074_v16 }
  0x3b   : > { %466 = vst.msk [vmem:[%s276_s7] sm:$0x3] %vm302_vm1, %v464_v18 }
  0x98   : > { %v656_v19 = vpop.permute.xlu0 %655 }
  0x99   : > { %954 = vmatpush3.xpose.msk.msra.mxu1 %vm565_vm5, %v656_v19 }
  0xa2   : > { %v654_v20 = vpop.permute.xlu0 %653 }
  0xa3   : > { %956 = vmatmul.mubr.msk.f32.vlgmr.msra.gmra.mrb[0].mxu1 %vm565_vm5, %v654_v20 }
 0x103   : > { %v636_v21 = vpop.f32.mrb[0].mxu0 }
 0x104   : > { %v641_v22 = vsel %vm640_vm6, %v636_v21, -inf  ;;  %v952_v23 = vpop.f32.mrb[1].mxu0 }
 0x105   : > { %642 = vmax.xlane.f32.xlu1 %v641_v22 }
 0x176   : > { %v727_v24 = vpop.f32.mrb[0].mxu1 }
 0x177   : > { %v957_v25 = vpop.f32.mrb[1].mxu1  ;;  %v731_v26 = vsel %vm640_vm6, %v727_v24, -inf }
 0x178   : > { %732 = vmax.xlane.f32.xlu1 %v731_v26 }
 0x192   : > { %v643_v16 = vpop.xlane.xlu1 %642 }
 0x193   : > { %v644_v27 = vsub.f32 %v636_v21, %v643_v16 }
 0x195   : > { %v645_v28 = vmul.f32 1.442695, %v644_v27 }
 0x197   : > { %986 = vpow2.f32 %v645_v28 }
 0x1a1   : > { %v987_v29 = vpop.eup %986 }
 0x1a2   : > { %v647_v30 = vsel %vm640_vm6, %v987_v29, 0.0 }
 0x1a3   : > { %648 = vadd.xlane.f32.xlu0 %v647_v30 }
 0x205   : > { %v733_v31 = vpop.xlane.xlu1 %732 }
 0x206   : > { %v734_v32 = vsub.f32 %v727_v24, %v733_v31 }
 0x208   : > { %v735_v33 = vmul.f32 1.442695, %v734_v32 }
 0x20a   : > { %988 = vpow2.f32 %v735_v33 }
 0x214   : > { %v989_v34 = vpop.eup %988 }
 0x215   : > { %v737_v35 = vsel %vm640_vm6, %v989_v34, 0.0 }
 0x216   : > { %738 = vadd.xlane.f32.xlu1 %v737_v35 }
 0x230   : > { %v649_v36 = vpop.xlane.xlu0 %648 }
 0x231   : > { %990 = vrcp.f32 %v649_v36 }
 0x23b   : > { %v991_v37 = vpop.eup %990 }
 0x23c   : > { %v651_v38 = vmul.f32 %v991_v37, %v987_v29 }
 0x23e   : > { %652 = vst.msk [vmem:[%s292_s11] sm:$0xf] %vm640_vm6, %v651_v38 }
 0x2a3   : > { %v739_v39 = vpop.xlane.xlu1 %738 }
 0x2a4   : > { %992 = vrcp.f32 %v739_v39 }
 0x2ae   : > { %v993_v40 = vpop.eup %992 }
 0x2af   : > { %v741_v41 = vmul.f32 %v993_v40, %v989_v34 }
 0x2b1   : > { %940 = vst.msk [vmem:[%s292_s11 + $0x4] sm:$0xf] %vm640_vm6, %v741_v41 }
 0x2b2 PF: > { %s15_s17 = sadd.s32 1, %s1016_s17   ;;  %s1153_s15 = smov %s1012_s16 }
 0x2b3   : > { %p12_p5 = scmp.ge.s32.totalorder %s15_s17, 4   ;;  %s1154_s16 = smov %s1156_s18 }
 0x2b5   :  { %14 = sbr.rel (!%p12_p5) target bundleno = 2 (0x2), region = 86 }

// kernel: nystromformer_forward.23
= control target key start
LH: loop header
LB: loop body
LE: loop exit
PB: predicated region body
PF: predicated region fallthrough
CT: control target
= control target key end

     0   :  { %v144_v0 = vmov 0.0   ;;  %vm145_vm0 = vmmov 0   ;;  %vm45_vm1 = vcmask 261120   ;;  %vm108_vm2 = vcmask 519168   ;;  %s184_s1 = inlined_call_operand.vmem [shape: bf16[32,64], index: 1, kind: input, shape index: {}]   ;;  %s185_s0 = inlined_call_operand.vmem [shape: bf16[16,32], index: 0, kind: input, shape index: {}]   ;;  %s186_s2 = inlined_call_operand.vmem [shape: f32[1,64], index: 2, kind: input, shape index: {}]   ;;  %s187_s3 = inlined_call_operand.vmem [shape: bf16[16,64], index: 3, kind: output, shape index: {}]  }
   0x1   :  { %127 = vmatprep.subr.bf16.mxu0 %v144_v0  ;;  %v137_v1 = vld [vmem:[%s184_s1] sm:$0xff]   ;;  %131 = vmatprep.mubr.msk.bf16.mxu0 %vm145_vm0, %v144_v0  ;;  %v138_v2 = vld [vmem:[%s184_s1 + $0x8] sm:$0xff]  }
   0x2   :  { %128 = vmatpush3.bf16.msra.mxu0 %v137_v1  ;;  %v139_v3 = vld [vmem:[%s185_s0] sm:$0xff]  }
   0x3   :  { %129 = vmatprep.subr.bf16.mxu0 %v144_v0  ;;  %v115_v4 = vld [vmem:[%s186_s2] ss:$0 sm:$0xff] }
   0x6   :  { %130 = vmatpush3.bf16.msra.mxu0 %v138_v2 }
   0x9   :  { %132 = vmatmul.mubr.msk.bf16.vlgmr.msra.gmra.mrb[0].mxu0 %vm45_vm1, %v139_v3 }
  0xdc   :  { %v83_v5 = vpop.f32.mrb[0].mxu0 }
  0xdd   :  { %v84_v6 = vadd.f32 %v115_v4, %v83_v5  ;;  %v133_v7 = vpop.f32.mrb[1].mxu0 }
  0xde   :  { %v86_v8 = vpop.f32.mrb[2].mxu0 }
  0xdf   :  { %v92_v9 = vmul.f32 0.70710677, %v84_v6  ;;  %v87_v10 = vadd.f32 %v115_v4, %v86_v8  ;;  %v134_v11 = vpop.f32.mrb[3].mxu0  ;;  %v90_v14 = vmul.f32 0.5, %v84_v6 }
  0xe1   :  { %140 = verf.f32 %v92_v9  ;;  %v93_v12 = vmul.f32 0.70710677, %v87_v10  ;;  %v91_v18 = vmul.f32 0.5, %v87_v10 }
  0xe3   :  { %142 = verf.f32 %v93_v12 }
  0xeb   :  { %v141_v13 = vpop.eup %140 }
  0xec   :  { %v96_v15 = vadd.f32 1.0, %v141_v13 }
  0xed   :  { %v143_v16 = vpop.eup %142 }
  0xee   :  { %v98_v17 = vmul.f32 %v96_v15, %v90_v14  ;;  %v97_v19 = vadd.f32 1.0, %v143_v16 }
  0xf0   :  { %v122_v20 = vpack.c.bf16 %v98_v17, %v98_v17  ;;  %v99_v21 = vmul.f32 %v97_v19, %v91_v18 }
  0xf2   :  { %109 = vst.msk [vmem:[%s187_s3] sm:$0xf] %vm108_vm2, %v122_v20  ;;  %v123_v22 = vpack.c.bf16 %v99_v21, %v99_v21 }
  0xf4   :  { %110 = vst.msk [vmem:[%s187_s3 + $0x4] sm:$0xf] %vm108_vm2, %v123_v22 }

// kernel: nystromformer_forward.22
= control target key start
LH: loop header
LB: loop body
LE: loop exit
PB: predicated region body
PF: predicated region fallthrough
CT: control target
= control target key end

     0   :  { %vm29_vm0 = vcmask 261120   ;;  %vm81_vm1 = vcmask 257024   ;;  %s153_s0 = inlined_call_operand.vmem [shape: bf16[16,32], index: 0, kind: input, shape index: {}]   ;;  %s154_s1 = inlined_call_operand.vmem [shape: bf16[16,32], index: 1, kind: input, shape index: {}]   ;;  %s155_s2 = inlined_call_operand.vmem [shape: f32[1,32], index: 2, kind: input, shape index: {}]   ;;  %s156_s3 = inlined_call_operand.vmem [shape: f32[1,32], index: 3, kind: input, shape index: {}]   ;;  %s157_s4 = inlined_call_operand.vmem [shape: bf16[16,32], index: 4, kind: output, shape index: {}]  }
   0x1   :  { %v95_v0 = vld [vmem:[%s153_s0] sm:$0xff]  }
   0x2   :  { %v99_v1 = vld [vmem:[%s154_s1] sm:$0xff]   ;;  %v96_v2 = vunpack.c.l.bf16 %v95_v0  ;;  %v97_v4 = vunpack.c.h.bf16 %v95_v0 }
   0x3   :  { %v100_v3 = vunpack.c.l.bf16 %v99_v1  ;;  %v101_v5 = vunpack.c.h.bf16 %v99_v1  ;;  %v88_v27 = vld [vmem:[%s155_s2] ss:$0 sm:$0xff] }
   0x4   :  { %v89_v29 = vld [vmem:[%s156_s3] ss:$0 sm:$0xff] }
   0x5   :  { %v25_v6 = vadd.f32 %v100_v3, %v96_v2  ;;  %v26_v7 = vadd.f32 %v101_v5, %v97_v4 }
   0x7   :  { %v30_v8 = vsel %vm29_vm0, %v25_v6, 0.0  ;;  %v33_v9 = vsel %vm29_vm0, %v26_v7, 0.0 }
   0x8   :  { %31 = vadd.xlane.f32.xlu0 %v30_v8 }
   0xc   :  { %34 = vadd.xlane.f32.xlu0 %v33_v9 }
  0x95   :  { %v32_v10 = vpop.xlane.xlu0 %31 }
  0x96   :  { %v37_v11 = vmul.f32 0.03125, %v32_v10 }
  0x98   :  { %v39_v12 = vsub.f32 %v25_v6, %v37_v11 }
  0x99   :  { %v35_v13 = vpop.xlane.xlu0 %34 }
  0x9a   :  { %v38_v14 = vmul.f32 0.03125, %v35_v13  ;;  %v41_v15 = vmul.f32 %v39_v12, %v39_v12 }
  0x9c   :  { %v40_v16 = vsub.f32 %v26_v7, %v38_v14  ;;  %v43_v17 = vsel %vm29_vm0, %v41_v15, 0.0 }
  0x9d   :  { %44 = vadd.xlane.f32.xlu1 %v43_v17 }
  0x9e   :  { %v42_v18 = vmul.f32 %v40_v16, %v40_v16 }
  0xa0   :  { %v46_v19 = vsel %vm29_vm0, %v42_v18, 0.0 }
  0xa1   :  { %47 = vadd.xlane.f32.xlu1 %v46_v19 }
 0x12a   :  { %v45_v20 = vpop.xlane.xlu1 %44 }
 0x12b   :  { %v49_v21 = vmul.f32 0.03125, %v45_v20 }
 0x12d   :  { %v51_v22 = vadd.f32 1e-05, %v49_v21 }
 0x12e   :  { %v48_v23 = vpop.xlane.xlu1 %47 }
 0x12f   :  { %102 = vrsqrt.f32 %v51_v22  ;;  %v50_v24 = vmul.f32 0.03125, %v48_v23 }
 0x131   :  { %v52_v25 = vadd.f32 1e-05, %v50_v24 }
 0x133   :  { %104 = vrsqrt.f32 %v52_v25 }
 0x139   :  { %v103_v26 = vpop.eup %102 }
 0x13a   :  { %v55_v28 = vmul.f32 %v103_v26, %v39_v12 }
 0x13c   :  { %v63_v30 = vmul.f32 %v88_v27, %v55_v28 }
 0x13d   :  { %v105_v31 = vpop.eup %104 }
 0x13e   :  { %v71_v32 = vadd.f32 %v89_v29, %v63_v30  ;;  %v56_v33 = vmul.f32 %v105_v31, %v40_v16 }
 0x140   :  { %v92_v34 = vpack.c.bf16 %v71_v32, %v71_v32  ;;  %v64_v35 = vmul.f32 %v88_v27, %v56_v33 }
 0x142   :  { %82 = vst.msk [vmem:[%s157_s4] sm:$0xf] %vm81_vm1, %v92_v34  ;;  %v72_v36 = vadd.f32 %v89_v29, %v64_v35 }
 0x144   :  { %v93_v37 = vpack.c.bf16 %v72_v36, %v72_v36 }
 0x146   :  { %83 = vst.msk [vmem:[%s157_s4 + $0x4] sm:$0xf] %vm81_vm1, %v93_v37 }

// kernel: nystromformer_forward.21
= control target key start
LH: loop header
LB: loop body
LE: loop exit
PB: predicated region body
PF: predicated region fallthrough
CT: control target
= control target key end

     0   :  { %v130_v0 = vmov 0.0   ;;  %vm131_vm0 = vmmov 0   ;;  %vm45_vm1 = vcmask 261120   ;;  %vm98_vm2 = vcmask 257024   ;;  %s170_s1 = inlined_call_operand.vmem [shape: bf16[32,32], index: 1, kind: input, shape index: {}]   ;;  %s171_s0 = inlined_call_operand.vmem [shape: bf16[16,32], index: 0, kind: input, shape index: {}]   ;;  %s172_s2 = inlined_call_operand.vmem [shape: f32[1,32], index: 2, kind: input, shape index: {}]   ;;  %s173_s3 = inlined_call_operand.vmem [shape: bf16[16,32], index: 3, kind: output, shape index: {}]  }
   0x1   :  { %117 = vmatprep.subr.bf16.mxu0 %v130_v0  ;;  %v127_v1 = vld [vmem:[%s170_s1] sm:$0xff]   ;;  %121 = vmatprep.mubr.msk.bf16.mxu0 %vm131_vm0, %v130_v0  ;;  %v128_v2 = vld [vmem:[%s170_s1 + $0x8] sm:$0xff]  }
   0x2   :  { %118 = vmatpush3.bf16.msra.mxu0 %v127_v1  ;;  %v129_v3 = vld [vmem:[%s171_s0] sm:$0xff]  }
   0x3   :  { %119 = vmatprep.subr.bf16.mxu0 %v130_v0  ;;  %v105_v4 = vld [vmem:[%s172_s2] ss:$0 sm:$0xff] }
   0x6   :  { %120 = vmatpush3.bf16.msra.mxu0 %v128_v2 }
   0x9   :  { %122 = vmatmul.mubr.msk.bf16.vlgmr.msra.gmra.mrb[0].mxu0 %vm45_vm1, %v129_v3 }
  0xdc   :  { %v83_v5 = vpop.f32.mrb[0].mxu0 }
  0xdd   :  { %v84_v6 = vadd.f32 %v105_v4, %v83_v5  ;;  %v123_v7 = vpop.f32.mrb[1].mxu0 }
  0xde   :  { %v86_v8 = vpop.f32.mrb[2].mxu0 }
  0xdf   :  { %v112_v9 = vpack.c.bf16 %v84_v6, %v84_v6  ;;  %v87_v10 = vadd.f32 %v105_v4, %v86_v8  ;;  %v124_v11 = vpop.f32.mrb[3].mxu0 }
  0xe1   :  { %99 = vst.msk [vmem:[%s173_s3] sm:$0xf] %vm98_vm2, %v112_v9  ;;  %v113_v12 = vpack.c.bf16 %v87_v10, %v87_v10 }
  0xe3   :  { %100 = vst.msk [vmem:[%s173_s3 + $0x4] sm:$0xf] %vm98_vm2, %v113_v12 }

// kernel: nystromformer_forward.20
= control target key start
LH: loop header
LB: loop body
LE: loop exit
PB: predicated region body
PF: predicated region fallthrough
CT: control target
= control target key end

     0   :  { %s1541_s21 = smov 0   ;;  %s1543_s22 = smov 0   ;;  %s1674_s0 = inlined_call_operand.vmem [shape: bf16[2,8,32], index: 0, kind: input, shape index: {}]   ;;  %s1675_s1 = inlined_call_operand.vmem [shape: bf16[2,8,32], index: 1, kind: input, shape index: {}]   ;;  %s1676_s2 = inlined_call_operand.vmem [shape: bf16[2,8,32], index: 2, kind: input, shape index: {}]   ;;  %s1677_s3 = inlined_call_operand.vmem [shape: bf16[2,4,32], index: 3, kind: input, shape index: {}]   ;;  %s1678_s4 = inlined_call_operand.vmem [shape: bf16[2,4,32], index: 4, kind: input, shape index: {}]   ;;  %s1679_s5 = inlined_call_operand.vmem [shape: f32[2,2,4,4], index: 5, kind: input, shape index: {}]   ;;  %s1680_s6 = inlined_call_operand.vmem [shape: bf16[2,8,32], index: 6, kind: output, shape index: {}]  }
   0x1   :  { %s1545_s23 = smov 0  }
   0x2 LB: > { %s35_s24 = sadd.s32 1, %s1495_s22  ;;  %p1323_p0 = scmp.ge.s32.totalorder %s1499_s23, 1  ;;  %s1499_s23 = sphi %s1545_s23, %s16_s23   ;;  %s1495_s22 = sphi %s1543_s22, %s1682_s22   ;;  %s1491_s21 = sphi %s1541_s21, %s1681_s21  }
   0x3   : > { %p37_p1 = scmp.ge.s32.totalorder %s35_s24, 2  ;;  %p317_p2 = scmp.lt.s32.totalorder %s1499_s23, 3 }
   0x5   : > { %s1684_s24 = smov (%p37_p1, %s35_s24), 0  ;;  %p318_p3 = pnand %p1323_p0, %p317_p2 }
   0x6   : > { %p394_p4 = scmp.lt.s32.totalorder (!%p318_p3), %s1491_s21, 1  ;;  %v652_v0 = vlaneseq (!%p318_p3)  ;;  %v1501_v1 = vmov (!%p318_p3), 0.0   ;;  %vm1502_vm0 = vmmov (!%p318_p3), 0   ;;  %v1503_v2 = vmov (!%p318_p3), 1983009808   ;;  %s1504_s9 = smov (!%p318_p3), 112  }
   0x7   : > { %321 = sbr.rel (%p318_p3) target bundleno = 1651 (0x673), region = 44  ;;  %1373 = vmatprep.subr.bf16.mxu0 (!%p318_p3), %v1501_v1  ;;  %1375 = vmatprep.mubr.msk.bf16.mxu0 (!%p318_p3), %vm1502_vm0, %v1501_v1  ;;  %v650_v3 = vunpack.c.l.s4 (!%p318_p3), %v1503_v2  ;;  %vm460_vm1 = vcmask (!%p318_p3), 130048   ;;  %vm507_vm2 = vcmask (!%p318_p3), 60416   ;;  %vm524_vm3 = vcmask (!%p318_p3), 1043456  }
   0x8   : > { %v653_v4 = vshrl.u32 (!%p318_p3), %v652_v0, 7  ;;  %1379 = vmatprep.subr.bf16.mxu1 (!%p318_p3), %v1501_v1  ;;  %1381 = vmatprep.mubr.msk.bf16.mxu1 (!%p318_p3), %vm1502_vm0, %v1501_v1  ;;  %vm520_vm4 = vcmask (!%p318_p3), 64512   ;;  %vm569_vm5 = vcmask (!%p318_p3), 31744   ;;  %vm646_vm6 = vcmask (!%p318_p3), 125952  }
   0x9   : > { %v651_v5 = vunpack.c.0.s8 (!%p318_p3), %v650_v3  ;;  %vm1149_vm7 = vcmask (!%p318_p3), 257024  }
   0xb   : > { %v654_v8 = vsub.s32 (!%p318_p3), %v651_v5, %v653_v4 }
   0xe   : > { %s1686_s21 = smov (!%p394_p4, %s1491_s21), 1 }
   0xf   : > { %s1568_s25 = sshll.u32 %s1686_s21, 2  ;;  %s1327_s26 = sshll.u32 %s1686_s21, 1 }
  0x10   : > { %s410_s29 = scalar_lea.vmem %s1675_s1, %s1568_s25  ;;  %s424_s8 = scalar_lea.vmem %s1677_s3, %s1327_s26 }
  0x11   : > { %v457_v6 = vld [vmem:[%s410_s29] sm:$0xf]  ;;  %s417_s12 = scalar_lea.vmem %s1676_s2, %s1568_s25  ;;  %s431_s15 = scalar_lea.vmem %s1678_s4, %s1327_s26 }
  0x12   : > { %v459_v7 = vld [vmem:[%s424_s8] sm:$0x3]  ;;  %v465_v9 = vsel %vm460_vm1, %v457_v6, 0  ;;  %v1336_v10 = vcombine.low %v457_v6, %v457_v6  ;;  %s403_s18 = scalar_lea.vmem %s1674_s0, %s1568_s25  ;;  %s1352_s19 = sshll.u32 %s1686_s21, 3 }
  0x13   : > { %1374 = vmatpush3.bf16.xpose.msra.mxu0 %v465_v9  ;;  %v655_v11 = vrot.slane %v459_v7, %v654_v8  ;;  %v458_v30 = vld [vmem:[%s417_s12] sm:$0xf]  ;;  %s1621_s27 = scalar_lea.vmem %s1679_s5, %s1352_s19  ;;  %s1505_s21 = smov 16  }
  0x14   : > { %661 = vrot.lane.b32.xlu0 %v1336_v10, %s1504_s9  ;;  %1390 = vmatprep.subr.bf16.mxu0 %v1501_v1  ;;  %v526_v31 = vsel %vm524_vm3, %v458_v30, 0  ;;  %v1338_v37 = vcombine.low %v458_v30, %v458_v30  ;;  %v853_v39 = vld [vmem:[%s431_s15] sm:$0x3]  ;;  %v1340_v63 = vld [vmem:[%s1621_s27 + $0x4] sm:$0xf]  ;;  %s451_s30 = scalar_lea.vmem %s1680_s6, %s1568_s25 }
  0x15   : > { %1380 = vmatpush3.bf16.msra.mxu1 %v526_v31  ;;  %v1004_v40 = vrot.slane %v853_v39, %v654_v8  ;;  %v852_v41 = vld [vmem:[%s403_s18] sm:$0xf]  ;;  %v859_v57 = vsel %vm460_vm1, %v853_v39, 0 }
  0x16   : > { %1385 = vmatprep.subr.mxu1 %v1501_v1  ;;  %v1346_v42 = vcombine.low %v852_v41, %v852_v41  ;;  %v568_v49 = vld [vmem:[%s1621_s27] sm:$0xf] }
  0x18   : > { %656 = vrot.lane.b32.xlu0 %v655_v11, %s1504_s9 }
  0x1a   : > { %1376 = vmatmul.mubr.msk.bf16.vlgmr.msra.gmra.mrb[0].mxu0 %vm460_vm1, %v459_v7 }
  0x1b   : > { %1392 = vmatprep.mubr.msk.bf16.mxu0 %vm1502_vm0, %v1501_v1 }
  0x86   : > { %v662_v12 = vpop.permute.xlu0 %661 }
  0x87   : > { %v667_v13 = vsel %vm460_vm1, %v662_v12, 0 }
  0x88   : > { %1391 = vmatpush3.bf16.xpose.msra.mxu0 %v667_v13 }
  0x89   : > { %1402 = vmatprep.subr.mxu0 %v1501_v1 }
  0x8a   : > { %v657_v14 = vpop.permute.xlu0 %656 }
  0x8f   : > { %1393 = vmatmul.mubr.msk.bf16.vlgmr.msra.gmra.mrb[4].mxu0 %vm460_vm1, %v657_v14 }
  0x90   : > { %1404 = vmatprep.mubr.msk.f32.mxu0 %vm1502_vm0, %v1501_v1 }
  0xed   : > { %v501_v15 = vpop.f32.mrb[0].mxu0 }
  0xee   : > { %v1377_v16 = vpop.f32.mrb[1].mxu0  ;;  %v508_v17 = vsel %vm507_vm2, %v501_v15, -inf }
  0xef   : > { %509 = vmax.xlane.f32.xlu1 %v508_v17  ;;  %v504_v18 = vpop.f32.mrb[2].mxu0 }
  0xf0   : > { %v1378_v19 = vpop.f32.mrb[3].mxu0 }
 0x162   : > { %v703_v20 = vpop.f32.mrb[4].mxu0 }
 0x163   : > { %v709_v21 = vsel %vm507_vm2, %v703_v20, -inf  ;;  %v1394_v22 = vpop.f32.mrb[5].mxu0 }
 0x164   : > { %710 = vmax.xlane.f32.xlu0 %v709_v21  ;;  %v706_v23 = vpop.f32.mrb[6].mxu0 }
 0x165   : > { %v1395_v24 = vpop.f32.mrb[7].mxu0 }
 0x17c   : > { %v510_v25 = vpop.xlane.xlu1 %509 }
 0x17d   : > { %v511_v26 = vsub.f32 %v501_v15, %v510_v25 }
 0x17f   : > { %v512_v27 = vmul.f32 1.442695, %v511_v26 }
 0x181   : > { %1461 = vpow2.f32 %v512_v27 }
 0x18b   : > { %v1462_v28 = vpop.eup %1461 }
 0x18c   : > { %v514_v29 = vsel %vm507_vm2, %v1462_v28, 0.0 }
 0x18d   : > { %515 = vadd.xlane.f32.xlu1 %v514_v29 }
 0x1f1   : > { %v711_v32 = vpop.xlane.xlu0 %710 }
 0x1f2   : > { %v712_v33 = vsub.f32 %v703_v20, %v711_v32 }
 0x1f4   : > { %v713_v34 = vmul.f32 1.442695, %v712_v33 }
 0x1f6   : > { %1463 = vpow2.f32 %v713_v34 }
 0x200   : > { %v1464_v35 = vpop.eup %1463 }
 0x201   : > { %v715_v36 = vsel %vm507_vm2, %v1464_v35, 0.0 }
 0x202   : > { %716 = vadd.xlane.f32.xlu1 %v715_v36 }
 0x213   : > { %724 = vrot.lane.b32.xlu1 %v1338_v37, %s1504_s9 }
 0x217   : > { %1005 = vrot.lane.b32.xlu1 %v1004_v40, %s1504_s9 }
 0x21a   : > { %v516_v38 = vpop.xlane.xlu1 %515 }
 0x21b   : > { %1465 = vrcp.f32 %v516_v38  ;;  %995 = vrot.lane.b32.xlu1 %v1346_v42, %s1504_s9 }
 0x225   : > { %v1466_v43 = vpop.eup %1465 }
 0x226   : > { %v518_v44 = vmul.f32 %v1466_v43, %v1462_v28 }
 0x228   : > { %v519_v45 = vpack.c.bf16 %v518_v44, %v518_v44 }
 0x22a   : > { %1382 = vmatmul.mubr.msk.bf16.vlgmr.msra.gmra.mrb[0].mxu1 %vm520_vm4, %v519_v45 }
 0x22b   : > { %1387 = vmatprep.mubr.msk.f32.mxu1 %vm1502_vm0, %v1501_v1 }
 0x28f   : > { %v717_v46 = vpop.xlane.xlu1 %716 }
 0x290   : > { %1467 = vrcp.f32 %v717_v46 }
 0x293   : > { %v725_v48 = vpop.permute.xlu1 %724 }
 0x294   : > { %v730_v52 = vsel %vm524_vm3, %v725_v48, 0 }
 0x297   : > { %v1006_v58 = vpop.permute.xlu1 %1005 }
 0x298   : > { %v1011_v59 = vsel %vm460_vm1, %v1006_v58, 0 }
 0x29a   : > { %v1468_v47 = vpop.eup %1467 }
 0x29b   : > { %v719_v50 = vmul.f32 %v1468_v47, %v1464_v35  ;;  %v996_v60 = vpop.permute.xlu1 %995 }
 0x29d   : > { %v720_v56 = vpack.c.bf16 %v719_v50, %v719_v50 }
 0x2fd   : > { %v562_v51 = vpop.f32.mrb[0].mxu1 }
 0x2fe   : > { %v1383_v53 = vpop.f32.mrb[1].mxu1  ;;  %1386 = vmatpush3.msk.msra.mxu1 %vm524_vm3, %v562_v51 }
 0x2ff   : > { %v565_v54 = vpop.f32.mrb[2].mxu1  ;;  %1388 = vmatmul.mubr.msk.f32.vlgmr.msra.gmra.mrb[4].mxu1 %vm569_vm5, %v568_v49  ;;  %1396 = vmatprep.subr.bf16.mxu1 %v1501_v1 }
 0x300   : > { %v1384_v55 = vpop.f32.mrb[3].mxu1  ;;  %1397 = vmatpush3.bf16.msra.mxu1 %v730_v52  ;;  %1398 = vmatprep.mubr.msk.bf16.mxu1 %vm1502_vm0, %v1501_v1 }
 0x301   : > { %1407 = vmatprep.subr.bf16.mxu1 %v1501_v1 }
 0x303   : > { %1399 = vmatmul.mubr.msk.bf16.vlgmr.msra.gmra.mrb[8].mxu1 %vm520_vm4, %v720_v56 }
 0x304   : > { %1409 = vmatprep.mubr.msk.bf16.mxu1 %vm1502_vm0, %v1501_v1 }
 0x309   : > { %1408 = vmatpush3.bf16.xpose.msra.mxu1 %v859_v57 }
 0x30a   : > { %1418 = vmatprep.subr.bf16.mxu1 %v1501_v1 }
 0x310   : > { %1410 = vmatmul.mubr.msk.bf16.vlgmr.msra.gmra.mrb[12].mxu1 %vm460_vm1, %v852_v41 }
 0x311   : > { %1419 = vmatpush3.bf16.xpose.msra.mxu1 %v1011_v59  ;;  %1420 = vmatprep.mubr.msk.bf16.mxu1 %vm1502_vm0, %v1501_v1 }
 0x318   : > { %1421 = vmatmul.mubr.msk.bf16.vlgmr.msra.gmra.mrb[16].mxu1 %vm460_vm1, %v996_v60 }
 0x3d2   : > { %v642_v61 = vpop.f32.mrb[4].mxu1 }
 0x3d3   : > { %647 = vst.msk [vmem:[#allocation2] sm:$0xf] %vm646_vm6, %v642_v61  ;;  %v1389_v62 = vpop.f32.mrb[5].mxu1 }
 0x3d6   : > { %v766_v0 = vpop.f32.mrb[8].mxu1 }
 0x3d7   : > { %v1400_v2 = vpop.f32.mrb[9].mxu1  ;;  %1403 = vmatpush3.msk.msra.mxu0 %vm524_vm3, %v766_v0 }
 0x3d8   : > { %v769_v3 = vpop.f32.mrb[10].mxu1  ;;  %1413 = vmatprep.subr.mxu0 %v1501_v1  ;;  %1405 = vmatmul.mubr.msk.f32.vlgmr.msra.gmra.mrb[8].mxu0 %vm569_vm5, %v1340_v63 }
 0x3d9   : > { %v1401_v4 = vpop.f32.mrb[11].mxu1  ;;  %1415 = vmatprep.mubr.msk.f32.mxu0 %vm1502_vm0, %v1501_v1 }
 0x3da   : > { %v914_v5 = vld [vmem:[#allocation2] sm:$0xf] }
 0x3db   : > { %1414 = vmatpush3.msk.msra.mxu0 %vm524_vm3, %v914_v5 }
 0x3dc   : > { %1424 = vmatprep.subr.mxu0 %v1501_v1 }
 0x3e3   : > { %v895_v6 = vpop.f32.mrb[12].mxu1 }
 0x3e4   : > { %v901_v7 = vmul.f32 0.25, %v895_v6  ;;  %v1411_v8 = vpop.f32.mrb[13].mxu1 }
 0x3e5   : > { %v898_v9 = vpop.f32.mrb[14].mxu1 }
 0x3e6   : > { %v903_v10 = vsel %vm569_vm5, %v901_v7, -inf  ;;  %v1412_v11 = vpop.f32.mrb[15].mxu1 }
 0x3e7   : > { %904 = vmax.xlane.f32.xlu1 %v903_v10 }
 0x3eb   : > { %v1047_v12 = vpop.f32.mrb[16].mxu1 }
 0x3ec   : > { %v1053_v13 = vmul.f32 0.25, %v1047_v12  ;;  %v1422_v14 = vpop.f32.mrb[17].mxu1 }
 0x3ed   : > { %v1050_v15 = vpop.f32.mrb[18].mxu1 }
 0x3ee   : > { %v1054_v16 = vsel %vm569_vm5, %v1053_v13, -inf  ;;  %v1423_v17 = vpop.f32.mrb[19].mxu1 }
 0x3ef   : > { %1055 = vmax.xlane.f32.xlu0 %v1054_v16 }
 0x474   : > { %v905_v18 = vpop.xlane.xlu1 %904 }
 0x475   : > { %v906_v19 = vsub.f32 %v901_v7, %v905_v18 }
 0x477   : > { %v907_v20 = vmul.f32 1.442695, %v906_v19 }
 0x479   : > { %1469 = vpow2.f32 %v907_v20 }
 0x47c   : > { %v1056_v21 = vpop.xlane.xlu0 %1055 }
 0x47d   : > { %v1057_v22 = vsub.f32 %v1053_v13, %v1056_v21 }
 0x47f   : > { %v1058_v23 = vmul.f32 1.442695, %v1057_v22 }
 0x481   : > { %1471 = vpow2.f32 %v1058_v23 }
 0x483   : > { %v1470_v24 = vpop.eup %1469 }
 0x484   : > { %v909_v25 = vsel %vm569_vm5, %v1470_v24, 0.0 }
 0x485   : > { %910 = vadd.xlane.f32.xlu0 %v909_v25 }
 0x48b   : > { %v1472_v26 = vpop.eup %1471 }
 0x48c   : > { %v1060_v27 = vsel %vm569_vm5, %v1472_v26, 0.0 }
 0x48d   : > { %1061 = vadd.xlane.f32.xlu0 %v1060_v27 }
 0x4ab   : > { %v846_v28 = vpop.f32.mrb[8].mxu0 }
 0x4ac   : > { %851 = vst.msk [vmem:[#allocation2 + $0x4] sm:$0xf] %vm646_vm6, %v846_v28  ;;  %v1406_v29 = vpop.f32.mrb[9].mxu0 }
 0x4b3   : > { %v1066_v34 = vld [vmem:[#allocation2 + $0x4] sm:$0xf] }
 0x512   : > { %v911_v30 = vpop.xlane.xlu0 %910 }
 0x513   : > { %1473 = vrcp.f32 %v911_v30 }
 0x51a   : > { %v1062_v31 = vpop.xlane.xlu0 %1061 }
 0x51b   : > { %1475 = vrcp.f32 %v1062_v31 }
 0x51d   : > { %v1474_v32 = vpop.eup %1473 }
 0x51e   : > { %v913_v33 = vmul.f32 %v1474_v32, %v1470_v24 }
 0x520   : > { %1416 = vmatmul.mubr.msk.f32.vlgmr.msra.gmra.mrb[10].mxu0 %vm569_vm5, %v913_v33 }
 0x521   : > { %1425 = vmatpush3.msk.msra.mxu0 %vm524_vm3, %v1066_v34  ;;  %1426 = vmatprep.mubr.msk.f32.mxu0 %vm1502_vm0, %v1501_v1 }
 0x525   : > { %v1476_v35 = vpop.eup %1475 }
 0x526   : > { %v1064_v36 = vmul.f32 %v1476_v35, %v1472_v26 }
 0x528   : > { %1427 = vmatmul.mubr.msk.f32.vlgmr.msra.gmra.mrb[12].mxu0 %vm569_vm5, %v1064_v36 }
 0x5f3   : > { %v988_v37 = vpop.f32.mrb[10].mxu0 }
 0x5f4   : > { %v1417_v38 = vpop.f32.mrb[11].mxu0 }
 0x5fb   : > { %v1139_v39 = vpop.f32.mrb[12].mxu0 }
 0x5fc   : > { %1144 = vrot.lane.b32.xlu0 %v1139_v39, %s1505_s21  ;;  %v1428_v40 = vpop.f32.mrb[13].mxu0 }
 0x66e   : > { %v1145_v41 = vpop.permute.xlu0 %1144 }
 0x66f   : > { %v1147_v42 = vsel %vm460_vm1, %v988_v37, %v1145_v41 }
 0x670   : > { %v1148_v43 = vpack.c.bf16 %v1147_v42, %v1147_v42 }
 0x672   : > { %1150 = vst.msk [vmem:[%s451_s30] sm:$0xf] %vm1149_vm7, %v1148_v43 }
 0x673 PF: > { %s16_s23 = sadd.s32 1, %s1499_s23   ;;  %s1681_s21 = smov %s1495_s22 }
 0x674   : > { %p13_p5 = scmp.ge.s32.totalorder %s16_s23, 4   ;;  %s1682_s22 = smov %s1684_s24 }
 0x676   :  { %15 = sbr.rel (!%p13_p5) target bundleno = 2 (0x2), region = 96 }

// kernel: nystromformer_forward.24
= control target key start
LH: loop header
LB: loop body
LE: loop exit
PB: predicated region body
PF: predicated region fallthrough
CT: control target
= control target key end

     0   :  { %v156_v0 = vmov 0.0   ;;  %vm157_vm0 = vmmov 0   ;;  %vm61_vm1 = vcmask 523264   ;;  %vm114_vm2 = vcmask 257024   ;;  %s202_s1 = inlined_call_operand.vmem [shape: bf16[64,32], index: 1, kind: input, shape index: {}]   ;;  %s203_s0 = inlined_call_operand.vmem [shape: bf16[16,64], index: 0, kind: input, shape index: {}]   ;;  %s204_s2 = inlined_call_operand.vmem [shape: f32[1,32], index: 2, kind: input, shape index: {}]   ;;  %s205_s3 = inlined_call_operand.vmem [shape: bf16[16,32], index: 3, kind: output, shape index: {}]  }
   0x1   :  { %137 = vmatprep.subr.bf16.mxu0 %v156_v0  ;;  %v151_v1 = vld [vmem:[%s202_s1] sm:$0xff]   ;;  %145 = vmatprep.mubr.msk.bf16.mxu0 %vm157_vm0, %v156_v0  ;;  %v152_v2 = vld [vmem:[%s202_s1 + $0x8] sm:$0xff]   ;;  %v153_v3 = vld [vmem:[%s202_s1 + $0x10] sm:$0xff]  }
   0x2   :  { %138 = vmatpush3.bf16.msra.mxu0 %v151_v1  ;;  %v154_v4 = vld [vmem:[%s202_s1 + $0x18] sm:$0xff]   ;;  %v155_v5 = vld [vmem:[%s203_s0] sm:$0xff]  }
   0x3   :  { %139 = vmatprep.subr.bf16.mxu0 %v156_v0  ;;  %v121_v6 = vld [vmem:[%s204_s2] ss:$0 sm:$0xff] }
   0x6   :  { %140 = vmatpush3.bf16.msra.mxu0 %v152_v2 }
   0x7   :  { %141 = vmatprep.subr.bf16.mxu0 %v156_v0 }
   0xa   :  { %142 = vmatpush3.bf16.msra.mxu0 %v153_v3 }
   0xb   :  { %143 = vmatprep.subr.bf16.mxu0 %v156_v0 }
   0xe   :  { %144 = vmatpush3.bf16.msra.mxu0 %v154_v4 }
  0x11   :  { %146 = vmatmul.mubr.msk.bf16.vlgmr.msra.gmra.mrb[0].mxu0 %vm61_vm1, %v155_v5 }
  0xe4   :  { %v99_v7 = vpop.f32.mrb[0].mxu0 }
  0xe5   :  { %v100_v8 = vadd.f32 %v121_v6, %v99_v7  ;;  %v147_v9 = vpop.f32.mrb[1].mxu0 }
  0xe6   :  { %v102_v10 = vpop.f32.mrb[2].mxu0 }
  0xe7   :  { %v130_v11 = vpack.c.bf16 %v100_v8, %v100_v8  ;;  %v103_v12 = vadd.f32 %v121_v6, %v102_v10  ;;  %v148_v13 = vpop.f32.mrb[3].mxu0 }
  0xe9   :  { %115 = vst.msk [vmem:[%s205_s3] sm:$0xf] %vm114_vm2, %v130_v11  ;;  %v131_v14 = vpack.c.bf16 %v103_v12, %v103_v12 }
  0xeb   :  { %116 = vst.msk [vmem:[%s205_s3 + $0x4] sm:$0xf] %vm114_vm2, %v131_v14 }

// kernel: nystromformer_forward.34
= control target key start
LH: loop header
LB: loop body
LE: loop exit
PB: predicated region body
PF: predicated region fallthrough
CT: control target
= control target key end

     0   :  { %vm20_vm0 = vcmask 261120   ;;  %vm72_vm1 = vcmask 257024   ;;  %s132_s0 = inlined_call_operand.vmem [shape: bf16[16,32], index: 0, kind: input, shape index: {}]   ;;  %s133_s1 = inlined_call_operand.vmem [shape: f32[1,32], index: 1, kind: input, shape index: {}]   ;;  %s134_s2 = inlined_call_operand.vmem [shape: f32[1,32], index: 2, kind: input, shape index: {}]   ;;  %s135_s3 = inlined_call_operand.vmem [shape: bf16[16,32], index: 3, kind: output, shape index: {}]  }
   0x1   :  { %v86_v0 = vld [vmem:[%s132_s0] sm:$0xff]  }
   0x2   :  { %v87_v1 = vunpack.c.l.bf16 %v86_v0  ;;  %v88_v2 = vunpack.c.h.bf16 %v86_v0  ;;  %v79_v22 = vld [vmem:[%s133_s1] ss:$0 sm:$0xff] }
   0x3   :  { %v80_v24 = vld [vmem:[%s134_s2] ss:$0 sm:$0xff] }
   0x4   :  { %v21_v3 = vsel %vm20_vm0, %v87_v1, 0.0  ;;  %v24_v4 = vsel %vm20_vm0, %v88_v2, 0.0 }
   0x5   :  { %22 = vadd.xlane.f32.xlu0 %v21_v3 }
   0x9   :  { %25 = vadd.xlane.f32.xlu0 %v24_v4 }
  0x92   :  { %v23_v5 = vpop.xlane.xlu0 %22 }
  0x93   :  { %v28_v6 = vmul.f32 0.03125, %v23_v5 }
  0x95   :  { %v30_v7 = vsub.f32 %v87_v1, %v28_v6 }
  0x96   :  { %v26_v8 = vpop.xlane.xlu0 %25 }
  0x97   :  { %v29_v9 = vmul.f32 0.03125, %v26_v8  ;;  %v32_v10 = vmul.f32 %v30_v7, %v30_v7 }
  0x99   :  { %v31_v11 = vsub.f32 %v88_v2, %v29_v9  ;;  %v34_v12 = vsel %vm20_vm0, %v32_v10, 0.0 }
  0x9a   :  { %35 = vadd.xlane.f32.xlu1 %v34_v12 }
  0x9b   :  { %v33_v13 = vmul.f32 %v31_v11, %v31_v11 }
  0x9d   :  { %v37_v14 = vsel %vm20_vm0, %v33_v13, 0.0 }
  0x9e   :  { %38 = vadd.xlane.f32.xlu1 %v37_v14 }
 0x127   :  { %v36_v15 = vpop.xlane.xlu1 %35 }
 0x128   :  { %v40_v16 = vmul.f32 0.03125, %v36_v15 }
 0x12a   :  { %v42_v17 = vadd.f32 1e-05, %v40_v16 }
 0x12b   :  { %v39_v18 = vpop.xlane.xlu1 %38 }
 0x12c   :  { %89 = vrsqrt.f32 %v42_v17  ;;  %v41_v19 = vmul.f32 0.03125, %v39_v18 }
 0x12e   :  { %v43_v20 = vadd.f32 1e-05, %v41_v19 }
 0x130   :  { %91 = vrsqrt.f32 %v43_v20 }
 0x136   :  { %v90_v21 = vpop.eup %89 }
 0x137   :  { %v46_v23 = vmul.f32 %v90_v21, %v30_v7 }
 0x139   :  { %v54_v25 = vmul.f32 %v79_v22, %v46_v23 }
 0x13a   :  { %v92_v26 = vpop.eup %91 }
 0x13b   :  { %v62_v27 = vadd.f32 %v80_v24, %v54_v25  ;;  %v47_v28 = vmul.f32 %v92_v26, %v31_v11 }
 0x13d   :  { %v83_v29 = vpack.c.bf16 %v62_v27, %v62_v27  ;;  %v55_v30 = vmul.f32 %v79_v22, %v47_v28 }
 0x13f   :  { %73 = vst.msk [vmem:[%s135_s3] sm:$0xf] %vm72_vm1, %v83_v29  ;;  %v63_v31 = vadd.f32 %v80_v24, %v55_v30 }
 0x141   :  { %v84_v32 = vpack.c.bf16 %v63_v31, %v63_v31 }
 0x143   :  { %74 = vst.msk [vmem:[%s135_s3 + $0x4] sm:$0xf] %vm72_vm1, %v84_v32 }

// kernel: nystromformer_forward.35
= control target key start
LH: loop header
LB: loop body
LE: loop exit
PB: predicated region body
PF: predicated region fallthrough
CT: control target
= control target key end

     0   :  { %v144_v1 = vmov 0.0   ;;  %vm145_vm0 = vmmov 0   ;;  %s191_s0 = inlined_call_operand.vmem [shape: bf16[2,32], index: 0, kind: input, shape index: {}]   ;;  %s192_s1 = inlined_call_operand.vmem [shape: bf16[32,8], index: 1, kind: input, shape index: {}]   ;;  %s193_s2 = inlined_call_operand.vmem [shape: f32[1,8], index: 2, kind: input, shape index: {}]   ;;  %s194_s3 = inlined_call_operand.hbm [shape: f32[2,8], index: 3, kind: output, shape index: {}]  }
   0x1   :  { %v118_v0 = vld [vmem:[%s192_s1] sm:$0xff]   ;;  %107 = vmatprep.subr.bf16.mxu0 %v144_v1  ;;  %v119_v2 = vld [vmem:[%s192_s1 + $0x8] sm:$0xff]   ;;  %111 = vmatprep.mubr.msk.bf16.mxu0 %vm145_vm0, %v144_v1 }
   0x2   :  { %108 = vmatpush3.bf16.msra.mxu0 %v118_v0 }
   0x3   :  { %109 = vmatprep.subr.bf16.mxu0 %v144_v1 }
   0x4   :  { %8 = vsyncpa [#allocation3], 0  ;;  %v16_v3 = vld [vmem:[%s191_s0] sm:$0x1]  ;;  %vm40_vm1 = vcmask 261120   ;;  %s146_s20 = smov [#allocation2]  }
   0x5   :  { %v100_v4 = vld [vmem:[%s193_s2] ss:$0 sm:$0xff]  ;;  %s92_s21 = sshll.u32 %s146_s20, 4  ;;  %vm84_vm2 = vcmask 58368   ;;  %s93_s21 = int_to_ptr.vmem [resolvable:$true] %s92_s21 }
   0x6   :  { %110 = vmatpush3.bf16.msra.mxu0 %v119_v2  ;;  %s120_s1 = scalar_lea.vmem %s93_s21, 32  ;;  %p125_p1 = scmp.lt.s32.totalorder %s93_s21, %s93_s21 }
   0x7   :  { %p121_p0 = scmp.ne.s32.totalorder %s93_s21, %s120_s1  ;;  %p126_p2 = scmp.lt.s32.totalorder %s120_s1, %s120_s1 }
   0x9   :  { %112 = vmatmul.mubr.msk.bf16.vlgmr.msra.gmra.mrb[0].mxu0 %vm40_vm1, %v16_v3  ;;  %p127_p3 = por %p126_p2, %p125_p1 }
   0xb   :  { %p128_p4 = pnand %p127_p3, %p121_p0 }
  0xdc   :  { %v78_v5 = vpop.f32.mrb[0].mxu0 }
  0xdd   :  { %v79_v6 = vadd.f32 %v100_v4, %v78_v5  ;;  %v113_v7 = vpop.f32.mrb[1].mxu0 }
  0xde   :  { %v81_v8 = vpop.f32.mrb[2].mxu0 }
  0xdf   :  { %v114_v9 = vpop.f32.mrb[3].mxu0  ;;  %85 = vst.msk [vmem:[#allocation2] sm:$0x3] %vm84_vm2, %v79_v6 }
  0xe0   :  { %131 = shalt.err (!%p128_p4)
}
  0xe1   :  { %s132_s2 = scalar_lea.hbm %s194_s3, 32 }
  0xe2   :  { %p133_p5 = scmp.ne.s32.totalorder %s194_s3, %s132_s2  ;;  %p136_p6 = scmp.lt.u32.totalorder %s132_s2, %s194_s3 }
  0xe4   :  { %p138_p7 = pnand %p136_p6, %p133_p5 }
  0xe6   :  { %141 = shalt.err (!%p138_p7)
}
  0xe7   :  { %95 = dma.vmem_to_hbm [thread:$0]  %s93_s21, 32, %s194_s3, [#allocation3]  }
  0xe8   :  { %142 = dma.done.wait [#allocation3], 32  }
  0xe9   :  { %143 = vsyncadd [#allocation3], 4294967264 }
  0xea   :  { %99 = vsyncpa [#allocation3], 1 }

</bundles_post_ra>
